<compile_context>
chip_gen: v5e
topology: v5e:2x2
jax: 0.10.0
libtpu: 0.0.40
codegen_flags: <defaults>
</compile_context>

<pallas_src>
import jax
import jax.numpy as jnp
from jax.experimental import pallas as pl
from jax.experimental.pallas import tpu as pltpu


# -----------------------------------------------------------------------------
# Kernel
# -----------------------------------------------------------------------------
def mlp_kernel(x_ref,
               w1_ref, b1_ref,
               w2_ref, b2_ref,
               w3_ref, b3_ref,
               w4_ref, b4_ref,
               w5_ref, b5_ref,
               o_ref):
    x = x_ref[...]                                            # (TB, 2) f32

    # Layer 1: K=2 contraction -> two VPU FMAs per row (MXU would waste a full
    # push->pop latency on a 2-deep contraction).  Fused ReLU + bf16 cast.
    h = (x[:, 0:1] * w1_ref[0:1, :]
         + x[:, 1:2] * w1_ref[1:2, :]
         + b1_ref[...])
    h = jnp.maximum(h, 0.0).astype(jnp.bfloat16)              # (TB, 64)

    # Layers 2-4: bf16 MXU matmul, f32 accumulate + bias, then a single fused
    # elementwise pass (relu + bf16 cast) feeding the next dot.  Keeps the
    # number of materialized (TB, 64) f32 temporaries minimal (v5e vst slot).
    h = jnp.maximum(
        jnp.dot(h, w2_ref[...], preferred_element_type=jnp.float32)
        + b2_ref[...], 0.0).astype(jnp.bfloat16)              # (TB, 64)

    h = jnp.maximum(
        jnp.dot(h, w3_ref[...], preferred_element_type=jnp.float32)
        + b3_ref[...], 0.0).astype(jnp.bfloat16)              # (TB, 64)

    h = jnp.maximum(
        jnp.dot(h, w4_ref[...], preferred_element_type=jnp.float32)
        + b4_ref[...], 0.0).astype(jnp.bfloat16)              # (TB, 32)

    # Layer 5: narrow 8-lane output (de-padded from 128).  8 B useful per row,
    # contiguous HBM write; only the VMEM vst is masked (same vreg count).
    out = (jnp.dot(h, w5_ref[...], preferred_element_type=jnp.float32)
           + b5_ref[...])                                     # (TB, 8) f32
    o_ref[...] = out.astype(o_ref.dtype)


# -----------------------------------------------------------------------------
# Parameter handling
# -----------------------------------------------------------------------------
def _round_up(n, m):
    return ((n + m - 1) // m) * m


def init_params(key):
    """PyTorch nn.Linear-style init. W stored [in, out], b stored [1, out]."""
    sizes = [(2, 50), (50, 50), (50, 50), (50, 25), (25, 2)]
    params = []
    for (fan_in, fan_out) in sizes:
        key, kw, kb = jax.random.split(key, 3)
        bound = 1.0 / jnp.sqrt(fan_in)
        w = jax.random.uniform(kw, (fan_in, fan_out), jnp.float32, -bound, bound)
        b = jax.random.uniform(kb, (1, fan_out), jnp.float32, -bound, bound)
        params.append((w, b))
    return params


def pad_params(params):
    """Zero-pad to TPU-friendly shapes (exactness preserved by zero padding).

    Layer 1 stays f32 (VPU path); layers 2-5 weights become bf16 for the MXU
    (one-time rounding of the f32 PyTorch weights).  Biases stay f32.
    Returns the flat list [w1, b1, w2, b2, ..., w5, b5].
    """
    (w1, b1), (w2, b2), (w3, b3), (w4, b4), (w5, b5) = params

    def pad(w, b, in_p, out_p, w_dtype):
        wp = jnp.zeros((in_p, out_p), jnp.float32)
        wp = wp.at[:w.shape[0], :w.shape[1]].set(w)
        bp = jnp.zeros((1, out_p), jnp.float32)
        bp = bp.at[:, :b.shape[1]].set(b.reshape(1, -1))
        return wp.astype(w_dtype), bp

    flat = []
    flat += pad(w1, b1, 2, 64, jnp.float32)      # VPU layer, f32
    flat += pad(w2, b2, 64, 64, jnp.bfloat16)
    flat += pad(w3, b3, 64, 64, jnp.bfloat16)
    flat += pad(w4, b4, 64, 32, jnp.bfloat16)
    flat += pad(w5, b5, 32, 8, jnp.bfloat16)     # de-padded output: 2 -> 8
    return flat


# -----------------------------------------------------------------------------
# Wrapper
# -----------------------------------------------------------------------------
def _choose_tb(B, tb):
    # Guarantee >= 2 grid steps so dimension_semantics=("parallel",) can shard
    # the batch axis across v7x's two TensorCores (neutral on v5e/v6e).
    TB = min(tb, _round_up(pl.cdiv(B, 2), 8))
    return max(TB, 8)


def _build_call(TB, Bp, flat_params, *, buffered_params):
    if buffered_params:
        def param_spec(a):
            return pl.BlockSpec(a.shape, lambda i: (0, 0),
                                pipeline_mode=pl.Buffered(1))
    else:
        def param_spec(a):
            return pl.BlockSpec(a.shape, lambda i: (0, 0))

    in_specs = [pl.BlockSpec((TB, 2), lambda i: (i, 0))]
    in_specs += [param_spec(a) for a in flat_params]

    # Advisory cost hint so XLA schedules neighboring HLOs sensibly.
    flops = 2 * Bp * (2 * 64 + 64 * 64 + 64 * 64 + 64 * 32 + 32 * 8)
    param_bytes = sum(int(a.size) * a.dtype.itemsize for a in flat_params)
    bytes_accessed = Bp * (2 * 4 + 8 * 4) + param_bytes

    return pl.pallas_call(
        mlp_kernel,
        out_shape=jax.ShapeDtypeStruct((Bp, 8), jnp.float32),
        grid=(pl.cdiv(Bp, TB),),
        in_specs=in_specs,
        out_specs=pl.BlockSpec((TB, 8), lambda i: (i, 0)),
        compiler_params=pltpu.CompilerParams(
            dimension_semantics=("parallel",)),   # megacore sharding on v7x
        cost_estimate=pl.CostEstimate(
            flops=flops, transcendentals=0, bytes_accessed=bytes_accessed),
    )


def prediction_machine_forward(x, flat_params, *, tb=4096):
    """x: [B, 2] float32. flat_params: output of pad_params()."""
    B, in_dim = x.shape
    assert in_dim == 2

    TB = _choose_tb(B, tb)                    # batch tile, multiple of 8
    Bp = _round_up(B, TB)
    xp = x if Bp == B else jnp.pad(x, ((0, Bp - B), (0, 0)))

    # Single-buffer the (never-changing) parameter blocks when supported;
    # fall back to default double-buffered specs otherwise.
    out_padded = None
    for buffered in (True, False):
        try:
            out_padded = _build_call(TB, Bp, flat_params,
                                     buffered_params=buffered)(xp, *flat_params)
            break
        except Exception:
            if not buffered:
                raise
    return out_padded[:B, :2]


# -----------------------------------------------------------------------------
# References
# -----------------------------------------------------------------------------
def reference_forward_f32(x, params):
    """Pure-f32 reference matching the original PyTorch module semantics."""
    h = x
    for i, (w, b) in enumerate(params):
        h = h @ w + b.reshape(1, -1)
        if i < len(params) - 1:
            h = jnp.maximum(h, 0.0)
    return h


def reference_forward_mirrored(x, flat_params):
    """Plain-JAX reference mirroring the kernel numerics exactly."""
    w1, b1, w2, b2, w3, b3, w4, b4, w5, b5 = flat_params
    h = x[:, 0:1] * w1[0:1, :] + x[:, 1:2] * w1[1:2, :] + b1
    h = jnp.maximum(h, 0.0).astype(jnp.bfloat16)
    for w, b in ((w2, b2), (w3, b3), (w4, b4)):
        h = jnp.maximum(
            jnp.dot(h, w, preferred_element_type=jnp.float32) + b,
            0.0).astype(jnp.bfloat16)
    out = jnp.dot(h, w5, preferred_element_type=jnp.float32) + b5
    return out[:, :2]


# -----------------------------------------------------------------------------
# Test
# -----------------------------------------------------------------------------
if __name__ == "__main__":
    key = jax.random.PRNGKey(0)
    key, kx = jax.random.split(key)

    # Not a multiple of the tile: exercises batch padding and a >= 2-step grid
    # (TB is clamped so the batch axis always has at least 2 grid iterations).
    B = 300
    x = jax.random.normal(kx, (B, 2), jnp.float32)

    params = init_params(key)
    flat = pad_params(params)

    out = prediction_machine_forward(x, flat)
    out = jax.block_until_ready(out)
    assert out.shape == (B, 2), out.shape

    # Exact-numerics check (same bf16/f32 mix as the kernel).
    ref_exact = reference_forward_mirrored(x, flat)
    err = jnp.max(jnp.abs(out - ref_exact))
    assert jnp.allclose(out, ref_exact, atol=1e-4, rtol=1e-4), f"max abs err {err}"

    # Semantic check against the pure-f32 PyTorch-equivalent forward
    # (loose tolerance: bf16 MXU operands in layers 2-5).
    ref_f32 = reference_forward_f32(x, params)
    err32 = jnp.max(jnp.abs(out - ref_f32))
    assert jnp.allclose(out, ref_f32, atol=1e-1, rtol=1e-1), f"max abs err {err32}"

    print("KERNEL_OK")
</pallas_src>

<mosaic_0001>
module attributes {stable_mosaic.version = 11 : i64} {
  func.func @mlp_kernel(%arg0: i32, %arg1: memref<152x2xf32, #tpu.memory_space<vmem>>, %arg2: memref<2x64xf32, #tpu.memory_space<vmem>>, %arg3: memref<1x64xf32, #tpu.memory_space<vmem>>, %arg4: memref<64x64xbf16, #tpu.memory_space<vmem>>, %arg5: memref<1x64xf32, #tpu.memory_space<vmem>>, %arg6: memref<64x64xbf16, #tpu.memory_space<vmem>>, %arg7: memref<1x64xf32, #tpu.memory_space<vmem>>, %arg8: memref<64x32xbf16, #tpu.memory_space<vmem>>, %arg9: memref<1x32xf32, #tpu.memory_space<vmem>>, %arg10: memref<32x8xbf16, #tpu.memory_space<vmem>>, %arg11: memref<1x8xf32, #tpu.memory_space<vmem>>, %arg12: memref<152x8xf32, #tpu.memory_space<vmem>>) attributes {dimension_semantics = [#tpu.dimension_semantics<parallel>], iteration_bounds = array<i64: 2>, scalar_prefetch = 0 : i64, scratch_operands = 0 : i64, tpu.core_type = #tpu.core_type<tc>, window_params = [{transform_indices = @transform_0, window_bounds = array<i64: 152, 2>}, {pipeline_mode = #tpu.pipeline_mode<synchronous>, transform_indices = @transform_1, window_bounds = array<i64: 2, 64>}, {pipeline_mode = #tpu.pipeline_mode<synchronous>, transform_indices = @transform_2, window_bounds = array<i64: 1, 64>}, {pipeline_mode = #tpu.pipeline_mode<synchronous>, transform_indices = @transform_3, window_bounds = array<i64: 64, 64>}, {pipeline_mode = #tpu.pipeline_mode<synchronous>, transform_indices = @transform_4, window_bounds = array<i64: 1, 64>}, {pipeline_mode = #tpu.pipeline_mode<synchronous>, transform_indices = @transform_5, window_bounds = array<i64: 64, 64>}, {pipeline_mode = #tpu.pipeline_mode<synchronous>, transform_indices = @transform_6, window_bounds = array<i64: 1, 64>}, {pipeline_mode = #tpu.pipeline_mode<synchronous>, transform_indices = @transform_7, window_bounds = array<i64: 64, 32>}, {pipeline_mode = #tpu.pipeline_mode<synchronous>, transform_indices = @transform_8, window_bounds = array<i64: 1, 32>}, {pipeline_mode = #tpu.pipeline_mode<synchronous>, transform_indices = @transform_9, window_bounds = array<i64: 32, 8>}, {pipeline_mode = #tpu.pipeline_mode<synchronous>, transform_indices = @transform_10, window_bounds = array<i64: 1, 8>}, {transform_indices = @transform_11, window_bounds = array<i64: 152, 8>}]} {
    %c0 = arith.constant 0 : index
    %c0_0 = arith.constant 0 : index
    %0 = vector.load %arg1[%c0, %c0_0] : memref<152x2xf32, #tpu.memory_space<vmem>>, vector<152x2xf32>
    %1 = vector.extract_strided_slice %0 {offsets = [0, 0], sizes = [152, 1], strides = [1, 1]} : vector<152x2xf32> to vector<152x1xf32>
    %c0_1 = arith.constant 0 : index
    %c0_2 = arith.constant 0 : index
    %2 = vector.load %arg2[%c0_1, %c0_2] : memref<2x64xf32, #tpu.memory_space<vmem>>, vector<1x64xf32>
    %3 = vector.broadcast %1 : vector<152x1xf32> to vector<152x64xf32>
    %4 = vector.broadcast %2 : vector<1x64xf32> to vector<152x64xf32>
    %5 = arith.mulf %3, %4 : vector<152x64xf32>
    %6 = vector.extract_strided_slice %0 {offsets = [0, 1], sizes = [152, 1], strides = [1, 1]} : vector<152x2xf32> to vector<152x1xf32>
    %c1 = arith.constant 1 : index
    %c0_3 = arith.constant 0 : index
    %7 = vector.load %arg2[%c1, %c0_3] : memref<2x64xf32, #tpu.memory_space<vmem>>, vector<1x64xf32>
    %8 = vector.broadcast %6 : vector<152x1xf32> to vector<152x64xf32>
    %9 = vector.broadcast %7 : vector<1x64xf32> to vector<152x64xf32>
    %10 = arith.mulf %8, %9 : vector<152x64xf32>
    %11 = arith.addf %5, %10 : vector<152x64xf32>
    %c0_4 = arith.constant 0 : index
    %c0_5 = arith.constant 0 : index
    %12 = vector.load %arg3[%c0_4, %c0_5] : memref<1x64xf32, #tpu.memory_space<vmem>>, vector<1x64xf32>
    %13 = vector.broadcast %12 : vector<1x64xf32> to vector<152x64xf32>
    %14 = arith.addf %11, %13 : vector<152x64xf32>
    %cst = arith.constant 0.000000e+00 : f32
    %15 = vector.broadcast %cst : f32 to vector<152x64xf32>
    %16 = arith.maximumf %14, %15 : vector<152x64xf32>
    %17 = arith.truncf %16 : vector<152x64xf32> to vector<152x64xbf16>
    %c0_6 = arith.constant 0 : index
    %c0_7 = arith.constant 0 : index
    %18 = vector.load %arg4[%c0_6, %c0_7] : memref<64x64xbf16, #tpu.memory_space<vmem>>, vector<64x64xbf16>
    %cst_8 = arith.constant dense<0.000000e+00> : vector<152x64xf32>
    %19 = tpu.matmul %17, %18, %cst_8 {dimension_numbers = #tpu.dot_dimension_numbers<[1], [0], [0], [1], [0, 0, 1, 1], [], []>} : vector<152x64xbf16>, vector<64x64xbf16>, vector<152x64xf32> -> vector<152x64xf32>
    %c0_9 = arith.constant 0 : index
    %c0_10 = arith.constant 0 : index
    %20 = vector.load %arg5[%c0_9, %c0_10] : memref<1x64xf32, #tpu.memory_space<vmem>>, vector<1x64xf32>
    %21 = vector.broadcast %20 : vector<1x64xf32> to vector<152x64xf32>
    %22 = arith.addf %19, %21 : vector<152x64xf32>
    %cst_11 = arith.constant 0.000000e+00 : f32
    %23 = vector.broadcast %cst_11 : f32 to vector<152x64xf32>
    %24 = arith.maximumf %22, %23 : vector<152x64xf32>
    %25 = arith.truncf %24 : vector<152x64xf32> to vector<152x64xbf16>
    %c0_12 = arith.constant 0 : index
    %c0_13 = arith.constant 0 : index
    %26 = vector.load %arg6[%c0_12, %c0_13] : memref<64x64xbf16, #tpu.memory_space<vmem>>, vector<64x64xbf16>
    %cst_14 = arith.constant dense<0.000000e+00> : vector<152x64xf32>
    %27 = tpu.matmul %25, %26, %cst_14 {dimension_numbers = #tpu.dot_dimension_numbers<[1], [0], [0], [1], [0, 0, 1, 1], [], []>} : vector<152x64xbf16>, vector<64x64xbf16>, vector<152x64xf32> -> vector<152x64xf32>
    %c0_15 = arith.constant 0 : index
    %c0_16 = arith.constant 0 : index
    %28 = vector.load %arg7[%c0_15, %c0_16] : memref<1x64xf32, #tpu.memory_space<vmem>>, vector<1x64xf32>
    %29 = vector.broadcast %28 : vector<1x64xf32> to vector<152x64xf32>
    %30 = arith.addf %27, %29 : vector<152x64xf32>
    %cst_17 = arith.constant 0.000000e+00 : f32
    %31 = vector.broadcast %cst_17 : f32 to vector<152x64xf32>
    %32 = arith.maximumf %30, %31 : vector<152x64xf32>
    %33 = arith.truncf %32 : vector<152x64xf32> to vector<152x64xbf16>
    %c0_18 = arith.constant 0 : index
    %c0_19 = arith.constant 0 : index
    %34 = vector.load %arg8[%c0_18, %c0_19] : memref<64x32xbf16, #tpu.memory_space<vmem>>, vector<64x32xbf16>
    %cst_20 = arith.constant dense<0.000000e+00> : vector<152x32xf32>
    %35 = tpu.matmul %33, %34, %cst_20 {dimension_numbers = #tpu.dot_dimension_numbers<[1], [0], [0], [1], [0, 0, 1, 1], [], []>} : vector<152x64xbf16>, vector<64x32xbf16>, vector<152x32xf32> -> vector<152x32xf32>
    %c0_21 = arith.constant 0 : index
    %c0_22 = arith.constant 0 : index
    %36 = vector.load %arg9[%c0_21, %c0_22] : memref<1x32xf32, #tpu.memory_space<vmem>>, vector<1x32xf32>
    %37 = vector.broadcast %36 : vector<1x32xf32> to vector<152x32xf32>
    %38 = arith.addf %35, %37 : vector<152x32xf32>
    %cst_23 = arith.constant 0.000000e+00 : f32
    %39 = vector.broadcast %cst_23 : f32 to vector<152x32xf32>
    %40 = arith.maximumf %38, %39 : vector<152x32xf32>
    %41 = arith.truncf %40 : vector<152x32xf32> to vector<152x32xbf16>
    %c0_24 = arith.constant 0 : index
    %c0_25 = arith.constant 0 : index
    %42 = vector.load %arg10[%c0_24, %c0_25] : memref<32x8xbf16, #tpu.memory_space<vmem>>, vector<32x8xbf16>
    %cst_26 = arith.constant dense<0.000000e+00> : vector<152x8xf32>
    %43 = tpu.matmul %41, %42, %cst_26 {dimension_numbers = #tpu.dot_dimension_numbers<[1], [0], [0], [1], [0, 0, 1, 1], [], []>} : vector<152x32xbf16>, vector<32x8xbf16>, vector<152x8xf32> -> vector<152x8xf32>
    %c0_27 = arith.constant 0 : index
    %c0_28 = arith.constant 0 : index
    %44 = vector.load %arg11[%c0_27, %c0_28] : memref<1x8xf32, #tpu.memory_space<vmem>>, vector<1x8xf32>
    %45 = vector.broadcast %44 : vector<1x8xf32> to vector<152x8xf32>
    %46 = arith.addf %43, %45 : vector<152x8xf32>
    %c0_29 = arith.constant 0 : index
    %c0_30 = arith.constant 0 : index
    %47 = vector.load %arg12[%c0_29, %c0_30] : memref<152x8xf32, #tpu.memory_space<vmem>>, vector<152x8xf32>
    tpu.vector_store %arg12[%c0_29, %c0_30], %46 {strides = array<i32>} : memref<152x8xf32, #tpu.memory_space<vmem>>, vector<152x8xf32>,
    return
  }
  func.func @transform_0(%arg0: i32) -> (i32, i32) {
    %c0_i32 = arith.constant 0 : i32
    %c0_i32_0 = arith.constant 0 : i32
    return %arg0, %c0_i32 : i32, i32
  }
  func.func @transform_1(%arg0: i32) -> (i32, i32) {
    %c0_i32 = arith.constant 0 : i32
    %c0_i32_0 = arith.constant 0 : i32
    %c0_i32_1 = arith.constant 0 : i32
    return %c0_i32, %c0_i32_0 : i32, i32
  }
  func.func @transform_2(%arg0: i32) -> (i32, i32) {
    %c0_i32 = arith.constant 0 : i32
    %c0_i32_0 = arith.constant 0 : i32
    %c0_i32_1 = arith.constant 0 : i32
    return %c0_i32, %c0_i32_0 : i32, i32
  }
  func.func @transform_3(%arg0: i32) -> (i32, i32) {
    %c0_i32 = arith.constant 0 : i32
    %c0_i32_0 = arith.constant 0 : i32
    %c0_i32_1 = arith.constant 0 : i32
    return %c0_i32, %c0_i32_0 : i32, i32
  }
  func.func @transform_4(%arg0: i32) -> (i32, i32) {
    %c0_i32 = arith.constant 0 : i32
    %c0_i32_0 = arith.constant 0 : i32
    %c0_i32_1 = arith.constant 0 : i32
    return %c0_i32, %c0_i32_0 : i32, i32
  }
  func.func @transform_5(%arg0: i32) -> (i32, i32) {
    %c0_i32 = arith.constant 0 : i32
    %c0_i32_0 = arith.constant 0 : i32
    %c0_i32_1 = arith.constant 0 : i32
    return %c0_i32, %c0_i32_0 : i32, i32
  }
  func.func @transform_6(%arg0: i32) -> (i32, i32) {
    %c0_i32 = arith.constant 0 : i32
    %c0_i32_0 = arith.constant 0 : i32
    %c0_i32_1 = arith.constant 0 : i32
    return %c0_i32, %c0_i32_0 : i32, i32
  }
  func.func @transform_7(%arg0: i32) -> (i32, i32) {
    %c0_i32 = arith.constant 0 : i32
    %c0_i32_0 = arith.constant 0 : i32
    %c0_i32_1 = arith.constant 0 : i32
    return %c0_i32, %c0_i32_0 : i32, i32
  }
  func.func @transform_8(%arg0: i32) -> (i32, i32) {
    %c0_i32 = arith.constant 0 : i32
    %c0_i32_0 = arith.constant 0 : i32
    %c0_i32_1 = arith.constant 0 : i32
    return %c0_i32, %c0_i32_0 : i32, i32
  }
  func.func @transform_9(%arg0: i32) -> (i32, i32) {
    %c0_i32 = arith.constant 0 : i32
    %c0_i32_0 = arith.constant 0 : i32
    %c0_i32_1 = arith.constant 0 : i32
    return %c0_i32, %c0_i32_0 : i32, i32
  }
  func.func @transform_10(%arg0: i32) -> (i32, i32) {
    %c0_i32 = arith.constant 0 : i32
    %c0_i32_0 = arith.constant 0 : i32
    %c0_i32_1 = arith.constant 0 : i32
    return %c0_i32, %c0_i32_0 : i32, i32
  }
  func.func @transform_11(%arg0: i32) -> (i32, i32) {
    %c0_i32 = arith.constant 0 : i32
    %c0_i32_0 = arith.constant 0 : i32
    return %arg0, %c0_i32 : i32, i32
  }
}

module attributes {stable_mosaic.version = 11 : i64} {
  func.func @mlp_kernel(%arg0: i32, %arg1: memref<152x2xf32, #tpu.memory_space<vmem>>, %arg2: memref<2x64xf32, #tpu.memory_space<vmem>>, %arg3: memref<1x64xf32, #tpu.memory_space<vmem>>, %arg4: memref<64x64xbf16, #tpu.memory_space<vmem>>, %arg5: memref<1x64xf32, #tpu.memory_space<vmem>>, %arg6: memref<64x64xbf16, #tpu.memory_space<vmem>>, %arg7: memref<1x64xf32, #tpu.memory_space<vmem>>, %arg8: memref<64x32xbf16, #tpu.memory_space<vmem>>, %arg9: memref<1x32xf32, #tpu.memory_space<vmem>>, %arg10: memref<32x8xbf16, #tpu.memory_space<vmem>>, %arg11: memref<1x8xf32, #tpu.memory_space<vmem>>, %arg12: memref<152x8xf32, #tpu.memory_space<vmem>>) attributes {dimension_semantics = [#tpu.dimension_semantics<parallel>], iteration_bounds = array<i64: 2>, scalar_prefetch = 0 : i64, scratch_operands = 0 : i64, tpu.core_type = #tpu.core_type<tc>, window_params = [{transform_indices = @transform_0, window_bounds = array<i64: 152, 2>}, {pipeline_mode = #tpu.pipeline_mode<synchronous>, transform_indices = @transform_1, window_bounds = array<i64: 2, 64>}, {pipeline_mode = #tpu.pipeline_mode<synchronous>, transform_indices = @transform_2, window_bounds = array<i64: 1, 64>}, {pipeline_mode = #tpu.pipeline_mode<synchronous>, transform_indices = @transform_3, window_bounds = array<i64: 64, 64>}, {pipeline_mode = #tpu.pipeline_mode<synchronous>, transform_indices = @transform_4, window_bounds = array<i64: 1, 64>}, {pipeline_mode = #tpu.pipeline_mode<synchronous>, transform_indices = @transform_5, window_bounds = array<i64: 64, 64>}, {pipeline_mode = #tpu.pipeline_mode<synchronous>, transform_indices = @transform_6, window_bounds = array<i64: 1, 64>}, {pipeline_mode = #tpu.pipeline_mode<synchronous>, transform_indices = @transform_7, window_bounds = array<i64: 64, 32>}, {pipeline_mode = #tpu.pipeline_mode<synchronous>, transform_indices = @transform_8, window_bounds = array<i64: 1, 32>}, {pipeline_mode = #tpu.pipeline_mode<synchronous>, transform_indices = @transform_9, window_bounds = array<i64: 32, 8>}, {pipeline_mode = #tpu.pipeline_mode<synchronous>, transform_indices = @transform_10, window_bounds = array<i64: 1, 8>}, {transform_indices = @transform_11, window_bounds = array<i64: 152, 8>}]} {
    %c0 = arith.constant 0 : index
    %c0_0 = arith.constant 0 : index
    %0 = vector.load %arg1[%c0, %c0_0] : memref<152x2xf32, #tpu.memory_space<vmem>>, vector<152x2xf32>
    %1 = vector.extract_strided_slice %0 {offsets = [0, 0], sizes = [152, 1], strides = [1, 1]} : vector<152x2xf32> to vector<152x1xf32>
    %c0_1 = arith.constant 0 : index
    %c0_2 = arith.constant 0 : index
    %2 = vector.load %arg2[%c0_1, %c0_2] : memref<2x64xf32, #tpu.memory_space<vmem>>, vector<1x64xf32>
    %3 = vector.broadcast %1 : vector<152x1xf32> to vector<152x64xf32>
    %4 = vector.broadcast %2 : vector<1x64xf32> to vector<152x64xf32>
    %5 = arith.mulf %3, %4 : vector<152x64xf32>
    %6 = vector.extract_strided_slice %0 {offsets = [0, 1], sizes = [152, 1], strides = [1, 1]} : vector<152x2xf32> to vector<152x1xf32>
    %c1 = arith.constant 1 : index
    %c0_3 = arith.constant 0 : index
    %7 = vector.load %arg2[%c1, %c0_3] : memref<2x64xf32, #tpu.memory_space<vmem>>, vector<1x64xf32>
    %8 = vector.broadcast %6 : vector<152x1xf32> to vector<152x64xf32>
    %9 = vector.broadcast %7 : vector<1x64xf32> to vector<152x64xf32>
    %10 = arith.mulf %8, %9 : vector<152x64xf32>
    %11 = arith.addf %5, %10 : vector<152x64xf32>
    %c0_4 = arith.constant 0 : index
    %c0_5 = arith.constant 0 : index
    %12 = vector.load %arg3[%c0_4, %c0_5] : memref<1x64xf32, #tpu.memory_space<vmem>>, vector<1x64xf32>
    %13 = vector.broadcast %12 : vector<1x64xf32> to vector<152x64xf32>
    %14 = arith.addf %11, %13 : vector<152x64xf32>
    %cst = arith.constant 0.000000e+00 : f32
    %15 = vector.broadcast %cst : f32 to vector<152x64xf32>
    %16 = arith.maximumf %14, %15 : vector<152x64xf32>
    %17 = arith.truncf %16 : vector<152x64xf32> to vector<152x64xbf16>
    %c0_6 = arith.constant 0 : index
    %c0_7 = arith.constant 0 : index
    %18 = vector.load %arg4[%c0_6, %c0_7] : memref<64x64xbf16, #tpu.memory_space<vmem>>, vector<64x64xbf16>
    %cst_8 = arith.constant dense<0.000000e+00> : vector<152x64xf32>
    %19 = tpu.matmul %17, %18, %cst_8 {dimension_numbers = #tpu.dot_dimension_numbers<[1], [0], [0], [1], [0, 0, 1, 1], [], []>} : vector<152x64xbf16>, vector<64x64xbf16>, vector<152x64xf32> -> vector<152x64xf32>
    %c0_9 = arith.constant 0 : index
    %c0_10 = arith.constant 0 : index
    %20 = vector.load %arg5[%c0_9, %c0_10] : memref<1x64xf32, #tpu.memory_space<vmem>>, vector<1x64xf32>
    %21 = vector.broadcast %20 : vector<1x64xf32> to vector<152x64xf32>
    %22 = arith.addf %19, %21 : vector<152x64xf32>
    %cst_11 = arith.constant 0.000000e+00 : f32
    %23 = vector.broadcast %cst_11 : f32 to vector<152x64xf32>
    %24 = arith.maximumf %22, %23 : vector<152x64xf32>
    %25 = arith.truncf %24 : vector<152x64xf32> to vector<152x64xbf16>
    %c0_12 = arith.constant 0 : index
    %c0_13 = arith.constant 0 : index
    %26 = vector.load %arg6[%c0_12, %c0_13] : memref<64x64xbf16, #tpu.memory_space<vmem>>, vector<64x64xbf16>
    %cst_14 = arith.constant dense<0.000000e+00> : vector<152x64xf32>
    %27 = tpu.matmul %25, %26, %cst_14 {dimension_numbers = #tpu.dot_dimension_numbers<[1], [0], [0], [1], [0, 0, 1, 1], [], []>} : vector<152x64xbf16>, vector<64x64xbf16>, vector<152x64xf32> -> vector<152x64xf32>
    %c0_15 = arith.constant 0 : index
    %c0_16 = arith.constant 0 : index
    %28 = vector.load %arg7[%c0_15, %c0_16] : memref<1x64xf32, #tpu.memory_space<vmem>>, vector<1x64xf32>
    %29 = vector.broadcast %28 : vector<1x64xf32> to vector<152x64xf32>
    %30 = arith.addf %27, %29 : vector<152x64xf32>
    %cst_17 = arith.constant 0.000000e+00 : f32
    %31 = vector.broadcast %cst_17 : f32 to vector<152x64xf32>
    %32 = arith.maximumf %30, %31 : vector<152x64xf32>
    %33 = arith.truncf %32 : vector<152x64xf32> to vector<152x64xbf16>
    %c0_18 = arith.constant 0 : index
    %c0_19 = arith.constant 0 : index
    %34 = vector.load %arg8[%c0_18, %c0_19] : memref<64x32xbf16, #tpu.memory_space<vmem>>, vector<64x32xbf16>
    %cst_20 = arith.constant dense<0.000000e+00> : vector<152x32xf32>
    %35 = tpu.matmul %33, %34, %cst_20 {dimension_numbers = #tpu.dot_dimension_numbers<[1], [0], [0], [1], [0, 0, 1, 1], [], []>} : vector<152x64xbf16>, vector<64x32xbf16>, vector<152x32xf32> -> vector<152x32xf32>
    %c0_21 = arith.constant 0 : index
    %c0_22 = arith.constant 0 : index
    %36 = vector.load %arg9[%c0_21, %c0_22] : memref<1x32xf32, #tpu.memory_space<vmem>>, vector<1x32xf32>
    %37 = vector.broadcast %36 : vector<1x32xf32> to vector<152x32xf32>
    %38 = arith.addf %35, %37 : vector<152x32xf32>
    %cst_23 = arith.constant 0.000000e+00 : f32
    %39 = vector.broadcast %cst_23 : f32 to vector<152x32xf32>
    %40 = arith.maximumf %38, %39 : vector<152x32xf32>
    %41 = arith.truncf %40 : vector<152x32xf32> to vector<152x32xbf16>
    %c0_24 = arith.constant 0 : index
    %c0_25 = arith.constant 0 : index
    %42 = vector.load %arg10[%c0_24, %c0_25] : memref<32x8xbf16, #tpu.memory_space<vmem>>, vector<32x8xbf16>
    %cst_26 = arith.constant dense<0.000000e+00> : vector<152x8xf32>
    %43 = tpu.matmul %41, %42, %cst_26 {dimension_numbers = #tpu.dot_dimension_numbers<[1], [0], [0], [1], [0, 0, 1, 1], [], []>} : vector<152x32xbf16>, vector<32x8xbf16>, vector<152x8xf32> -> vector<152x8xf32>
    %c0_27 = arith.constant 0 : index
    %c0_28 = arith.constant 0 : index
    %44 = vector.load %arg11[%c0_27, %c0_28] : memref<1x8xf32, #tpu.memory_space<vmem>>, vector<1x8xf32>
    %45 = vector.broadcast %44 : vector<1x8xf32> to vector<152x8xf32>
    %46 = arith.addf %43, %45 : vector<152x8xf32>
    %c0_29 = arith.constant 0 : index
    %c0_30 = arith.constant 0 : index
    %47 = vector.load %arg12[%c0_29, %c0_30] : memref<152x8xf32, #tpu.memory_space<vmem>>, vector<152x8xf32>
    tpu.vector_store %arg12[%c0_29, %c0_30], %46 {strides = array<i32>} : memref<152x8xf32, #tpu.memory_space<vmem>>, vector<152x8xf32>,
    return
  }
  func.func @transform_0(%arg0: i32) -> (i32, i32) {
    %c0_i32 = arith.constant 0 : i32
    %c0_i32_0 = arith.constant 0 : i32
    return %arg0, %c0_i32 : i32, i32
  }
  func.func @transform_1(%arg0: i32) -> (i32, i32) {
    %c0_i32 = arith.constant 0 : i32
    %c0_i32_0 = arith.constant 0 : i32
    %c0_i32_1 = arith.constant 0 : i32
    return %c0_i32, %c0_i32_0 : i32, i32
  }
  func.func @transform_2(%arg0: i32) -> (i32, i32) {
    %c0_i32 = arith.constant 0 : i32
    %c0_i32_0 = arith.constant 0 : i32
    %c0_i32_1 = arith.constant 0 : i32
    return %c0_i32, %c0_i32_0 : i32, i32
  }
  func.func @transform_3(%arg0: i32) -> (i32, i32) {
    %c0_i32 = arith.constant 0 : i32
    %c0_i32_0 = arith.constant 0 : i32
    %c0_i32_1 = arith.constant 0 : i32
    return %c0_i32, %c0_i32_0 : i32, i32
  }
  func.func @transform_4(%arg0: i32) -> (i32, i32) {
    %c0_i32 = arith.constant 0 : i32
    %c0_i32_0 = arith.constant 0 : i32
    %c0_i32_1 = arith.constant 0 : i32
    return %c0_i32, %c0_i32_0 : i32, i32
  }
  func.func @transform_5(%arg0: i32) -> (i32, i32) {
    %c0_i32 = arith.constant 0 : i32
    %c0_i32_0 = arith.constant 0 : i32
    %c0_i32_1 = arith.constant 0 : i32
    return %c0_i32, %c0_i32_0 : i32, i32
  }
  func.func @transform_6(%arg0: i32) -> (i32, i32) {
    %c0_i32 = arith.constant 0 : i32
    %c0_i32_0 = arith.constant 0 : i32
    %c0_i32_1 = arith.constant 0 : i32
    return %c0_i32, %c0_i32_0 : i32, i32
  }
  func.func @transform_7(%arg0: i32) -> (i32, i32) {
    %c0_i32 = arith.constant 0 : i32
    %c0_i32_0 = arith.constant 0 : i32
    %c0_i32_1 = arith.constant 0 : i32
    return %c0_i32, %c0_i32_0 : i32, i32
  }
  func.func @transform_8(%arg0: i32) -> (i32, i32) {
    %c0_i32 = arith.constant 0 : i32
    %c0_i32_0 = arith.constant 0 : i32
    %c0_i32_1 = arith.constant 0 : i32
    return %c0_i32, %c0_i32_0 : i32, i32
  }
  func.func @transform_9(%arg0: i32) -> (i32, i32) {
    %c0_i32 = arith.constant 0 : i32
    %c0_i32_0 = arith.constant 0 : i32
    %c0_i32_1 = arith.constant 0 : i32
    return %c0_i32, %c0_i32_0 : i32, i32
  }
  func.func @transform_10(%arg0: i32) -> (i32, i32) {
    %c0_i32 = arith.constant 0 : i32
    %c0_i32_0 = arith.constant 0 : i32
    %c0_i32_1 = arith.constant 0 : i32
    return %c0_i32, %c0_i32_0 : i32, i32
  }
  func.func @transform_11(%arg0: i32) -> (i32, i32) {
    %c0_i32 = arith.constant 0 : i32
    %c0_i32_0 = arith.constant 0 : i32
    return %arg0, %c0_i32 : i32, i32
  }
}

</mosaic_0001>

<bundles_post_ra>
// kernel: tpu_custom_call.1
= control target key start
LH: loop header
LB: loop body
LE: loop exit
PB: predicated region body
PF: predicated region fallthrough
CT: control target
= control target key end

     0   :  { %s1567_s17 = smov 0   ;;  %s1924_s0 = inlined_call_operand.vmem [shape: f32[304,2], index: 0, kind: input, shape index: {}]   ;;  %s1925_s1 = inlined_call_operand.vmem [shape: f32[2,64], index: 1, kind: input, shape index: {}]   ;;  %s1926_s2 = inlined_call_operand.vmem [shape: f32[1,64], index: 2, kind: input, shape index: {}]   ;;  %s1927_s3 = inlined_call_operand.vmem [shape: bf16[64,64], index: 3, kind: input, shape index: {}]   ;;  %s1928_s4 = inlined_call_operand.vmem [shape: f32[1,64], index: 4, kind: input, shape index: {}]   ;;  %s1929_s5 = inlined_call_operand.vmem [shape: bf16[64,64], index: 5, kind: input, shape index: {}]   ;;  %s1930_s6 = inlined_call_operand.vmem [shape: f32[1,64], index: 6, kind: input, shape index: {}]   ;;  %s1931_s7 = inlined_call_operand.vmem [shape: bf16[64,32], index: 7, kind: input, shape index: {}]   ;;  %s1932_s8 = inlined_call_operand.vmem [shape: f32[1,32], index: 8, kind: input, shape index: {}]   ;;  %s1933_s9 = inlined_call_operand.vmem [shape: bf16[32,8], index: 9, kind: input, shape index: {}]   ;;  %s1934_s10 = inlined_call_operand.vmem [shape: f32[1,8], index: 10, kind: input, shape index: {}]   ;;  %s1935_s11 = inlined_call_operand.vmem [shape: f32[304,8], index: 11, kind: output, shape index: {}]  }
   0x1 LB: > { %s1339_s18 = sadd.s32 4294967295, %s1503_s17   ;;  %p1343_p0 = scmp.ge.s32.totalorder %s1503_s17, 1  ;;  %s1503_s17 = sphi %s1567_s17, %s21_s17  }
   0x2   : > { %p338_p1 = scmp.lt.s32.totalorder %s1503_s17, 3 }
   0x4   : > { %p339_p2 = pnand %p1343_p0, %p338_p1 }
   0x5   : > { %s378_s19 = smul.u32 (!%p339_p2), 19, %s1339_s18 }
   0x6   : > { %342 = sbr.rel (%p339_p2) target bundleno = 858 (0x35a), region = 64 }
   0x7   : > { %p379_p3 = scmp.lt.s32.totalorder (!%p339_p2), %s378_s19, 37 }
   0xb   : > { %v1505_v0 = vmov 1   ;;  %v1506_v1 = vmov 0   ;;  %s1937_s19 = smov (!%p379_p3, %s378_s19), 37  ;;  %v1447_v17 = vld [vmem:[%s1927_s3 + $0x18] sm:$0xff]  ;;  %v1446_v20 = vld [vmem:[%s1927_s3 + $0x10] sm:$0xff]  ;;  %v1445_v21 = vld [vmem:[%s1927_s3 + $0x8] sm:$0xff] }
   0xc   : > { %1469 = vset.pattern.permute.xlu1 %v1505_v0  ;;  %1468 = vset.pattern.permute.xlu0 %v1506_v1  ;;  %s1344_s20 = sshll.u32 %s1937_s19, 3  ;;  %v1444_v23 = vld [vmem:[%s1927_s3] sm:$0xff]  ;;  %vm730_vm0 = vcmask 523264   ;;  %vm1174_vm1 = vcmask 261120   ;;  %vm1263_vm2 = vcmask 64512  }
   0xd   : > { %1470 = vset.pattern.permute.xlu2 %v1506_v1  ;;  %s1586_s23 = scalar_lea.vmem %s1924_s0, %s1344_s20  ;;  %765 = vmatpush.bf16.msra.mxu0 %v1447_v17  ;;  %v1641_v25 = vld [vmem:[%s1925_s1] ss:$0 sm:$0xff]  ;;  %v1646_v26 = vld [vmem:[%s1925_s1 + $0x1] ss:$0 sm:$0xff]  ;;  %s1860_s18 = scalar_lea.vmem %s1935_s11, %s1344_s20 }
   0xe   : > { %v391_v2 = vld [vmem:[%s1586_s23] sm:$0xff]  ;;  %v393_v3 = vld [vmem:[%s1586_s23 + $0x10] sm:$0xff]  ;;  %v392_v4 = vld [vmem:[%s1586_s23 + $0x8] sm:$0xff] }
   0xf   : > { %528 = vperm.xlu1 %1469, %v391_v2   ;;  %413 = vperm.xlu0 %1468, %v391_v2   ;;  %v394_v5 = vld [vmem:[%s1586_s23 + $0x18] sm:$0xff]  ;;  %v395_v6 = vld [vmem:[%s1586_s23 + $0x20] sm:$0xff]  ;;  %v396_v7 = vld [vmem:[%s1586_s23 + $0x28] sm:$0xff] }
  0x10   : > { %423 = vperm.xlu2 %1470, %v393_v3   ;;  %v397_v8 = vld [vmem:[%s1586_s23 + $0x30] sm:$0xff]  ;;  %v398_v9 = vld [vmem:[%s1586_s23 + $0x38] sm:$0xff]  ;;  %v400_v10 = vld [vmem:[%s1586_s23 + $0x48] sm:$0xff] }
  0x11   : > { %v399_v11 = vld [vmem:[%s1586_s23 + $0x40] sm:$0xff]  ;;  %v401_v12 = vld [vmem:[%s1586_s23 + $0x50] sm:$0xff]  ;;  %v404_v13 = vld [vmem:[%s1586_s23 + $0x68] sm:$0xff]  ;;  %766 = vmatpush.bf16.msra.mxu0 %v1446_v20 }
  0x12   : > { %v402_v14 = vld [vmem:[%s1586_s23 + $0x58] sm:$0xff]  ;;  %v405_v15 = vld [vmem:[%s1586_s23 + $0x70] sm:$0xff]  ;;  %v403_v16 = vld [vmem:[%s1586_s23 + $0x60] sm:$0xff] }
  0x13   : > { %v408_v18 = vld [vmem:[%s1586_s23 + $0x88] sm:$0xff]  ;;  %v406_v19 = vld [vmem:[%s1586_s23 + $0x78] sm:$0xff]  ;;  %v407_v22 = vld [vmem:[%s1586_s23 + $0x80] sm:$0xff] }
  0x14   : > { %v409_v24 = vld [vmem:[%s1586_s23 + $0x90] sm:$0xff]  ;;  %v1653_v32 = vld [vmem:[%s1926_s2] ss:$0 sm:$0xff] }
  0x15   : > { %767 = vmatpush.bf16.msra.mxu0 %v1445_v21 }
  0x17   : > { %532 = vperm.xlu1 %1469, %v392_v4   ;;  %418 = vperm.xlu0 %1468, %v392_v4  }
  0x18   : > { %428 = vperm.xlu2 %1470, %v394_v5  }
  0x19   : > { %768 = vmatpush.bf16.msra.mxu0 %v1444_v23 }
  0x1f   : > { %540 = vperm.xlu1 %1469, %v394_v5   ;;  %1471 = vset.pattern.permute.xlu0 %v1505_v0 }
  0x20   : > { %536 = vperm.xlu0 %1471, %v393_v3   ;;  %433 = vperm.xlu2 %1470, %v395_v6  }
  0x27   : > { %1472 = vset.pattern.permute.xlu1 %v1506_v1 }
  0x28   : > { %438 = vperm.xlu1 %1472, %v396_v7   ;;  %548 = vperm.xlu0 %1471, %v396_v7  }
  0x29   : > { %1473 = vset.pattern.permute.xlu2 %v1505_v0 }
  0x2a   : > { %544 = vperm.xlu2 %1473, %v395_v6  }
  0x30   : > { %443 = vperm.xlu1 %1472, %v397_v8   ;;  %552 = vperm.xlu0 %1471, %v397_v8  }
  0x32   : > { %1474 = vset.pattern.permute.xlu2 %v1506_v1 }
  0x33   : > { %448 = vperm.xlu2 %1474, %v398_v9  }
  0x38   : > { %1475 = vset.pattern.permute.xlu1 %v1505_v0  ;;  %1476 = vset.pattern.permute.xlu0 %v1506_v1 }
  0x39   : > { %556 = vperm.xlu1 %1475, %v398_v9   ;;  %458 = vperm.xlu0 %1476, %v400_v10  }
  0x3b   : > { %453 = vperm.xlu2 %1474, %v399_v11  }
  0x41   : > { %560 = vperm.xlu1 %1475, %v399_v11   ;;  %1480 = vset.pattern.permute.xlu0 %v1505_v0 }
  0x42   : > { %568 = vperm.xlu0 %1480, %v401_v12  }
  0x43   : > { %1477 = vset.pattern.permute.xlu2 %v1505_v0 }
  0x44   : > { %564 = vperm.xlu2 %1477, %v400_v10  }
  0x49   : > { %1478 = vset.pattern.permute.xlu1 %v1506_v1 }
  0x4a   : > { %463 = vperm.xlu1 %1478, %v401_v12   ;;  %580 = vperm.xlu0 %1480, %v404_v13  }
  0x4c   : > { %1479 = vset.pattern.permute.xlu2 %v1506_v1 }
  0x4d   : > { %468 = vperm.xlu2 %1479, %v402_v14  }
  0x52   : > { %1481 = vset.pattern.permute.xlu1 %v1505_v0  ;;  %584 = vperm.xlu0 %1480, %v405_v15  }
  0x53   : > { %572 = vperm.xlu1 %1481, %v402_v14  }
  0x55   : > { %473 = vperm.xlu2 %1479, %v403_v16  }
  0x5a   : > { %1486 = vset.pattern.permute.xlu0 %v1506_v1 }
  0x5b   : > { %1482 = vset.pattern.permute.xlu1 %v1506_v1  ;;  %498 = vperm.xlu0 %1486, %v408_v18  }
  0x5c   : > { %478 = vperm.xlu1 %1482, %v404_v13  }
  0x5d   : > { %1483 = vset.pattern.permute.xlu2 %v1505_v0 }
  0x5e   : > { %576 = vperm.xlu2 %1483, %v403_v16  }
  0x63   : > { %1489 = vset.pattern.permute.xlu0 %v1505_v0 }
  0x64   : > { %483 = vperm.xlu1 %1482, %v405_v15  }
  0x66   : > { %1484 = vset.pattern.permute.xlu2 %v1506_v1 }
  0x67   : > { %488 = vperm.xlu2 %1484, %v406_v19  }
  0x6a   : > { %v424_v29 = vpop.permute.xlu2 %423 }
  0x6b   : > { %v509_v50 = vmul.f32 %v1641_v25, %v424_v29 }
  0x6c   : > { %1485 = vset.pattern.permute.xlu1 %v1505_v0 }
  0x6d   : > { %588 = vperm.xlu1 %1485, %v406_v19  }
  0x6f   : > { %493 = vperm.xlu2 %1484, %v407_v22  }
  0x72   : > { %v429_v40 = vpop.permute.xlu2 %428 }
  0x73   : > { %v510_v45 = vmul.f32 %v1641_v25, %v429_v40 }
  0x75   : > { %592 = vperm.xlu1 %1485, %v407_v22  }
  0x77   : > { %1487 = vset.pattern.permute.xlu2 %v1505_v0 }
  0x78   : > { %596 = vperm.xlu2 %1487, %v408_v18  }
  0x7a   : > { %v434_v53 = vpop.permute.xlu2 %433 }
  0x7b   : > { %v511_v0 = vmul.f32 %v1641_v25, %v434_v53 }
  0x7d   : > { %1488 = vset.pattern.permute.xlu1 %v1506_v1 }
  0x7e   : > { %503 = vperm.xlu1 %1488, %v409_v24  }
  0x80   : > { %600 = vperm.xlu2 %1487, %v409_v24  }
  0x81   : > { %v529_v27 = vpop.permute.xlu1 %528  ;;  %v414_v28 = vpop.permute.xlu0 %413 }
  0x82   : > { %v604_v30 = vmul.f32 %v1646_v26, %v529_v27  ;;  %v507_v31 = vmul.f32 %v1641_v25, %v414_v28 }
  0x84   : > { %v623_v33 = vadd.f32 %v604_v30, %v507_v31  ;;  %v545_v60 = vpop.permute.xlu2 %544 }
  0x85   : > { %v608_v1 = vmul.f32 %v1646_v26, %v545_v60 }
  0x86   : > { %v646_v38 = vadd.f32 %v1653_v32, %v623_v33 }
  0x87   : > { %v627_v4 = vadd.f32 %v608_v1, %v511_v0 }
  0x88   : > { %v665_v42 = vmax.f32 %v646_v38, 0.0 }
  0x89   : > { %v533_v34 = vpop.permute.xlu1 %532  ;;  %v419_v35 = vpop.permute.xlu0 %418  ;;  %v650_v7 = vadd.f32 %v1653_v32, %v627_v4 }
  0x8a   : > { %v605_v36 = vmul.f32 %v1646_v26, %v533_v34  ;;  %v508_v37 = vmul.f32 %v1641_v25, %v419_v35 }
  0x8b   : > { %v669_v10 = vmax.f32 %v650_v7, 0.0 }
  0x8c   : > { %v624_v39 = vadd.f32 %v605_v36, %v508_v37 }
  0x8d   : > { %v449_v6 = vpop.permute.xlu2 %448 }
  0x8e   : > { %v647_v41 = vadd.f32 %v1653_v32, %v624_v39  ;;  %v514_v12 = vmul.f32 %v1641_v25, %v449_v6 }
  0x90   : > { %v666_v43 = vmax.f32 %v647_v41, 0.0 }
  0x91   : > { %v541_v44 = vpop.permute.xlu1 %540 }
  0x92   : > { %v607_v46 = vmul.f32 %v1646_v26, %v541_v44  ;;  %v537_v47 = vpop.permute.xlu0 %536  ;;  %v684_v48 = vpack.c.bf16 %v666_v43, %v665_v42 }
  0x93   : > { %v606_v49 = vmul.f32 %v1646_v26, %v537_v47 }
  0x94   : > { %1362 = vmatmul.msk.bf16.vlgmr.msra.gmra.mxu0 %vm730_vm0, %v684_v48  ;;  %v626_v51 = vadd.f32 %v607_v46, %v510_v45 }
  0x95   : > { %v625_v52 = vadd.f32 %v606_v49, %v509_v50  ;;  %v454_v17 = vpop.permute.xlu2 %453 }
  0x96   : > { %v649_v54 = vadd.f32 %v1653_v32, %v626_v51  ;;  %v515_v29 = vmul.f32 %v1641_v25, %v454_v17 }
  0x97   : > { %v648_v55 = vadd.f32 %v1653_v32, %v625_v52 }
  0x98   : > { %v668_v57 = vmax.f32 %v649_v54, 0.0 }
  0x99   : > { %v667_v58 = vmax.f32 %v648_v55, 0.0 }
  0x9a   : > { %v439_v56 = vpop.permute.xlu1 %438  ;;  %v549_v59 = vpop.permute.xlu0 %548 }
  0x9b   : > { %v512_v61 = vmul.f32 %v1641_v25, %v439_v56  ;;  %v609_v62 = vmul.f32 %v1646_v26, %v549_v59  ;;  %v685_v63 = vpack.c.bf16 %v668_v57, %v667_v58 }
  0x9d   : > { %v628_v3 = vadd.f32 %v609_v62, %v512_v61 }
  0x9e   : > { %v565_v24 = vpop.permute.xlu2 %564 }
  0x9f   : > { %v651_v5 = vadd.f32 %v1653_v32, %v628_v3  ;;  %v613_v31 = vmul.f32 %v1646_v26, %v565_v24 }
  0xa1   : > { %v670_v8 = vmax.f32 %v651_v5, 0.0 }
  0xa2   : > { %v444_v2 = vpop.permute.xlu1 %443  ;;  %v553_v11 = vpop.permute.xlu0 %552 }
  0xa3   : > { %v686_v14 = vpack.c.bf16 %v670_v8, %v669_v10  ;;  %v513_v15 = vmul.f32 %v1641_v25, %v444_v2  ;;  %v610_v16 = vmul.f32 %v1646_v26, %v553_v11  ;;  %v1451_v10 = vld [vmem:[%s1929_s5 + $0x18] sm:$0xff] }
  0xa4   : > { %1363 = vmatmul.msk.bf16.gmra.mxu0 %vm730_vm0, %v685_v63  ;;  %918 = vmatpush.bf16.msra.mxu1 %v1451_v10 }
  0xa5   : > { %v629_v19 = vadd.f32 %v610_v16, %v513_v15  ;;  %v1450_v15 = vld [vmem:[%s1929_s5 + $0x10] sm:$0xff] }
  0xa7   : > { %v652_v21 = vadd.f32 %v1653_v32, %v629_v19  ;;  %v469_v40 = vpop.permute.xlu2 %468 }
  0xa8   : > { %v518_v43 = vmul.f32 %v1641_v25, %v469_v40  ;;  %919 = vmatpush.bf16.msra.mxu1 %v1450_v15 }
  0xa9   : > { %v671_v28 = vmax.f32 %v652_v21, 0.0 }
  0xab   : > { %v557_v9 = vpop.permute.xlu1 %556  ;;  %v459_v27 = vpop.permute.xlu0 %458 }
  0xac   : > { %v611_v13 = vmul.f32 %v1646_v26, %v557_v9  ;;  %v516_v33 = vmul.f32 %v1641_v25, %v459_v27 }
  0xae   : > { %v630_v18 = vadd.f32 %v611_v13, %v514_v12  ;;  %v632_v36 = vadd.f32 %v613_v31, %v516_v33 }
  0xaf   : > { %v474_v50 = vpop.permute.xlu2 %473 }
  0xb0   : > { %v653_v20 = vadd.f32 %v1653_v32, %v630_v18  ;;  %v655_v39 = vadd.f32 %v1653_v32, %v632_v36  ;;  %v519_v59 = vmul.f32 %v1641_v25, %v474_v50  ;;  %v1732_v50 = vld [vmem:[%s1928_s4] ss:$0 sm:$0xff] }
  0xb2   : > { %v672_v23 = vmax.f32 %v653_v20, 0.0  ;;  %v674_v42 = vmax.f32 %v655_v39, 0.0  ;;  %v1449_v20 = vld [vmem:[%s1929_s5 + $0x8] sm:$0xff] }
  0xb3   : > { %v561_v22 = vpop.permute.xlu1 %560  ;;  %920 = vmatpush.bf16.msra.mxu1 %v1449_v20 }
  0xb4   : > { %1364 = vmatmul.msk.bf16.gmra.mxu0 %vm730_vm0, %v686_v14  ;;  %v612_v30 = vmul.f32 %v1646_v26, %v561_v22  ;;  %v687_v34 = vpack.c.bf16 %v672_v23, %v671_v28  ;;  %v569_v45 = vpop.permute.xlu0 %568  ;;  %v1448_v23 = vld [vmem:[%s1929_s5] sm:$0xff] }
  0xb5   : > { %v614_v48 = vmul.f32 %v1646_v26, %v569_v45 }
  0xb6   : > { %v631_v35 = vadd.f32 %v612_v30, %v515_v29 }
  0xb7   : > { %921 = vmatpush.bf16.msra.mxu1 %v1448_v23 }
  0xb8   : > { %v654_v38 = vadd.f32 %v1653_v32, %v631_v35  ;;  %v577_v58 = vpop.permute.xlu2 %576 }
  0xb9   : > { %v616_v63 = vmul.f32 %v1646_v26, %v577_v58 }
  0xba   : > { %v673_v41 = vmax.f32 %v654_v38, 0.0 }
  0xbb   : > { %v635_v3 = vadd.f32 %v616_v63, %v519_v59 }
  0xbc   : > { %v464_v37 = vpop.permute.xlu1 %463  ;;  %v688_v49 = vpack.c.bf16 %v674_v42, %v673_v41  ;;  %v581_v60 = vpop.permute.xlu0 %580 }
  0xbd   : > { %v517_v46 = vmul.f32 %v1641_v25, %v464_v37  ;;  %v617_v62 = vmul.f32 %v1646_v26, %v581_v60  ;;  %v658_v5 = vadd.f32 %v1653_v32, %v635_v3 }
  0xbf   : > { %v633_v52 = vadd.f32 %v614_v48, %v517_v46  ;;  %v677_v8 = vmax.f32 %v658_v5, 0.0 }
  0xc1   : > { %v656_v54 = vadd.f32 %v1653_v32, %v633_v52  ;;  %v489_v6 = vpop.permute.xlu2 %488 }
  0xc2   : > { %v522_v12 = vmul.f32 %v1641_v25, %v489_v6 }
  0xc3   : > { %v675_v57 = vmax.f32 %v656_v54, 0.0 }
  0xc4   : > { %1365 = vmatmul.msk.bf16.gmra.mxu0 %vm730_vm0, %v687_v34  ;;  %v585_v11 = vpop.permute.xlu0 %584 }
  0xc5   : > { %v573_v44 = vpop.permute.xlu1 %572  ;;  %v618_v17 = vmul.f32 %v1646_v26, %v585_v11 }
  0xc6   : > { %v615_v47 = vmul.f32 %v1646_v26, %v573_v44 }
  0xc8   : > { %v634_v51 = vadd.f32 %v615_v47, %v518_v43 }
  0xc9   : > { %v494_v18 = vpop.permute.xlu2 %493 }
  0xca   : > { %v657_v53 = vadd.f32 %v1653_v32, %v634_v51  ;;  %v523_v33 = vmul.f32 %v1641_v25, %v494_v18 }
  0xcc   : > { %v676_v56 = vmax.f32 %v657_v53, 0.0 }
  0xcd   : > { %v499_v30 = vpop.permute.xlu0 %498 }
  0xce   : > { %v479_v55 = vpop.permute.xlu1 %478  ;;  %v689_v0 = vpack.c.bf16 %v676_v56, %v675_v57  ;;  %v524_v36 = vmul.f32 %v1641_v25, %v499_v30 }
  0xcf   : > { %v520_v61 = vmul.f32 %v1641_v25, %v479_v55 }
  0xd1   : > { %v636_v2 = vadd.f32 %v617_v62, %v520_v61 }
  0xd2   : > { %v597_v28 = vpop.permute.xlu2 %596 }
  0xd3   : > { %v659_v4 = vadd.f32 %v1653_v32, %v636_v2  ;;  %v621_v34 = vmul.f32 %v1646_v26, %v597_v28 }
  0xd4   : > { %1366 = vmatmul.msk.bf16.gmra.mxu0 %vm730_vm0, %v688_v49 }
  0xd5   : > { %v678_v7 = vmax.f32 %v659_v4, 0.0  ;;  %v640_v39 = vadd.f32 %v621_v34, %v524_v36  ;;  %v1455_v36 = vld [vmem:[%s1931_s7 + $0x18] sm:$0xff] }
  0xd6   : > { %v484_v1 = vpop.permute.xlu1 %483  ;;  %1071 = vmatpush.bf16.msra.mxu2 %v1455_v36 }
  0xd7   : > { %v690_v14 = vpack.c.bf16 %v678_v7, %v677_v8  ;;  %v521_v16 = vmul.f32 %v1641_v25, %v484_v1  ;;  %v663_v41 = vadd.f32 %v1653_v32, %v640_v39 }
  0xd9   : > { %v637_v21 = vadd.f32 %v618_v17, %v521_v16  ;;  %v682_v43 = vmax.f32 %v663_v41, 0.0 }
  0xda   : > { %v601_v44 = vpop.permute.xlu2 %600 }
  0xdb   : > { %v660_v24 = vadd.f32 %v1653_v32, %v637_v21  ;;  %v622_v47 = vmul.f32 %v1646_v26, %v601_v44 }
  0xdd   : > { %v679_v31 = vmax.f32 %v660_v24, 0.0 }
  0xdf   : > { %v589_v9 = vpop.permute.xlu1 %588 }
  0xe0   : > { %v619_v13 = vmul.f32 %v1646_v26, %v589_v9 }
  0xe2   : > { %v638_v19 = vadd.f32 %v619_v13, %v522_v12 }
  0xe4   : > { %1367 = vmatmul.msk.bf16.gmra.mxu0 %vm730_vm0, %v689_v0  ;;  %v661_v22 = vadd.f32 %v1653_v32, %v638_v19 }
  0xe6   : > { %v680_v27 = vmax.f32 %v661_v22, 0.0 }
  0xe7   : > { %v593_v29 = vpop.permute.xlu1 %592 }
  0xe8   : > { %v620_v35 = vmul.f32 %v1646_v26, %v593_v29  ;;  %v691_v37 = vpack.c.bf16 %v680_v27, %v679_v31 }
  0xea   : > { %v639_v38 = vadd.f32 %v620_v35, %v523_v33 }
  0xec   : > { %v662_v40 = vadd.f32 %v1653_v32, %v639_v38 }
  0xee   : > { %v681_v42 = vmax.f32 %v662_v40, 0.0  ;;  %v1454_v40 = vld [vmem:[%s1931_s7 + $0x10] sm:$0xff] }
  0xef   : > { %1072 = vmatpush.bf16.msra.mxu2 %v1454_v40 }
  0xf0   : > { %v504_v45 = vpop.permute.xlu1 %503  ;;  %v692_v49 = vpack.c.bf16 %v682_v43, %v681_v42  ;;  %v1453_v42 = vld [vmem:[%s1931_s7 + $0x8] sm:$0xff]  ;;  %v1452_v43 = vld [vmem:[%s1931_s7] sm:$0xff] }
  0xf1   : > { %v525_v48 = vmul.f32 %v1641_v25, %v504_v45 }
  0xf3   : > { %v641_v51 = vadd.f32 %v622_v47, %v525_v48  ;;  %1073 = vmatpush.bf16.msra.mxu2 %v1453_v42 }
  0xf4   : > { %1368 = vmatmul.msk.bf16.gmra.mxu0 %vm730_vm0, %v690_v14 }
  0xf5   : > { %v664_v54 = vadd.f32 %v1653_v32, %v641_v51 }
  0xf7   : > { %v683_v25 = vmax.f32 %v664_v54, 0.0  ;;  %1074 = vmatpush.bf16.msra.mxu2 %v1452_v43 }
  0xf9   : > { %v693_v59 = vpack.c.bf16 %v683_v25, %v683_v25  ;;  %v1778_v25 = vld [vmem:[%s1930_s6] ss:$0 sm:$0xff] }
 0x104   : > { %1369 = vmatmul.msk.bf16.gmra.mxu0 %vm730_vm0, %v691_v37 }
 0x111   : > { %v770_v46 = vpop.f32.mrf.mxu0 }
 0x112   : > { %v771_v52 = vadd.f32 %v1732_v50, %v770_v46 }
 0x114   : > { %1370 = vmatmul.msk.bf16.gmra.mxu0 %vm730_vm0, %v692_v49  ;;  %v819_v56 = vmax.f32 %v771_v52, 0.0 }
 0x119   : > { %v772_v53 = vpop.f32.mrf.mxu0 }
 0x11a   : > { %v773_v55 = vadd.f32 %v1732_v50, %v772_v53 }
 0x11c   : > { %v820_v26 = vmax.f32 %v773_v55, 0.0 }
 0x11e   : > { %v838_v57 = vpack.c.bf16 %v820_v26, %v819_v56 }
 0x120   : > { %1388 = vmatmul.msk.bf16.vlgmr.msra.gmra.mxu1 %vm730_vm0, %v838_v57 }
 0x121   : > { %v775_v58 = vpop.f32.mrf.mxu0 }
 0x122   : > { %v776_v60 = vadd.f32 %v1732_v50, %v775_v58 }
 0x124   : > { %1371 = vmatmul.msk.bf16.gmra.mxu0 %vm730_vm0, %v693_v59  ;;  %v821_v63 = vmax.f32 %v776_v60, 0.0 }
 0x129   : > { %v777_v61 = vpop.f32.mrf.mxu0 }
 0x12a   : > { %v778_v62 = vadd.f32 %v1732_v50, %v777_v61 }
 0x12c   : > { %v822_v0 = vmax.f32 %v778_v62, 0.0 }
 0x12e   : > { %v839_v32 = vpack.c.bf16 %v822_v0, %v821_v63 }
 0x130   : > { %1389 = vmatmul.msk.bf16.gmra.mxu1 %vm730_vm0, %v839_v32 }
 0x131   : > { %v780_v1 = vpop.f32.mrf.mxu0 }
 0x132   : > { %v781_v2 = vadd.f32 %v1732_v50, %v780_v1 }
 0x134   : > { %v823_v5 = vmax.f32 %v781_v2, 0.0 }
 0x139   : > { %v782_v3 = vpop.f32.mrf.mxu0 }
 0x13a   : > { %v783_v4 = vadd.f32 %v1732_v50, %v782_v3 }
 0x13c   : > { %v824_v6 = vmax.f32 %v783_v4, 0.0 }
 0x13e   : > { %v840_v7 = vpack.c.bf16 %v824_v6, %v823_v5 }
 0x140   : > { %1390 = vmatmul.msk.bf16.gmra.mxu1 %vm730_vm0, %v840_v7 }
 0x141   : > { %v785_v8 = vpop.f32.mrf.mxu0 }
 0x142   : > { %v786_v9 = vadd.f32 %v1732_v50, %v785_v8 }
 0x144   : > { %v825_v12 = vmax.f32 %v786_v9, 0.0 }
 0x149   : > { %v787_v10 = vpop.f32.mrf.mxu0 }
 0x14a   : > { %v788_v11 = vadd.f32 %v1732_v50, %v787_v10 }
 0x14c   : > { %v826_v13 = vmax.f32 %v788_v11, 0.0 }
 0x14e   : > { %v841_v14 = vpack.c.bf16 %v826_v13, %v825_v12 }
 0x150   : > { %1391 = vmatmul.msk.bf16.gmra.mxu1 %vm730_vm0, %v841_v14 }
 0x151   : > { %v790_v15 = vpop.f32.mrf.mxu0 }
 0x152   : > { %v791_v16 = vadd.f32 %v1732_v50, %v790_v15 }
 0x154   : > { %v827_v19 = vmax.f32 %v791_v16, 0.0 }
 0x159   : > { %v792_v17 = vpop.f32.mrf.mxu0 }
 0x15a   : > { %v793_v18 = vadd.f32 %v1732_v50, %v792_v17 }
 0x15c   : > { %v828_v20 = vmax.f32 %v793_v18, 0.0 }
 0x15e   : > { %v842_v21 = vpack.c.bf16 %v828_v20, %v827_v19 }
 0x160   : > { %1392 = vmatmul.msk.bf16.gmra.mxu1 %vm730_vm0, %v842_v21 }
 0x161   : > { %v795_v22 = vpop.f32.mrf.mxu0 }
 0x162   : > { %v796_v23 = vadd.f32 %v1732_v50, %v795_v22 }
 0x164   : > { %v829_v28 = vmax.f32 %v796_v23, 0.0 }
 0x169   : > { %v797_v24 = vpop.f32.mrf.mxu0 }
 0x16a   : > { %v798_v27 = vadd.f32 %v1732_v50, %v797_v24 }
 0x16c   : > { %v830_v29 = vmax.f32 %v798_v27, 0.0 }
 0x16e   : > { %v843_v30 = vpack.c.bf16 %v830_v29, %v829_v28 }
 0x170   : > { %1393 = vmatmul.msk.bf16.gmra.mxu1 %vm730_vm0, %v843_v30 }
 0x171   : > { %v800_v31 = vpop.f32.mrf.mxu0 }
 0x172   : > { %v801_v33 = vadd.f32 %v1732_v50, %v800_v31 }
 0x174   : > { %v831_v37 = vmax.f32 %v801_v33, 0.0 }
 0x179   : > { %v802_v34 = vpop.f32.mrf.mxu0 }
 0x17a   : > { %v803_v35 = vadd.f32 %v1732_v50, %v802_v34 }
 0x17c   : > { %v832_v38 = vmax.f32 %v803_v35, 0.0 }
 0x17e   : > { %v844_v39 = vpack.c.bf16 %v832_v38, %v831_v37 }
 0x180   : > { %1394 = vmatmul.msk.bf16.gmra.mxu1 %vm730_vm0, %v844_v39 }
 0x181   : > { %v805_v41 = vpop.f32.mrf.mxu0 }
 0x182   : > { %v806_v44 = vadd.f32 %v1732_v50, %v805_v41 }
 0x184   : > { %v833_v47 = vmax.f32 %v806_v44, 0.0 }
 0x189   : > { %v807_v45 = vpop.f32.mrf.mxu0 }
 0x18a   : > { %v808_v46 = vadd.f32 %v1732_v50, %v807_v45 }
 0x18c   : > { %v834_v48 = vmax.f32 %v808_v46, 0.0 }
 0x18e   : > { %v845_v49 = vpack.c.bf16 %v834_v48, %v833_v47 }
 0x190   : > { %1395 = vmatmul.msk.bf16.gmra.mxu1 %vm730_vm0, %v845_v49 }
 0x191   : > { %v810_v51 = vpop.f32.mrf.mxu0 }
 0x192   : > { %v811_v52 = vadd.f32 %v1732_v50, %v810_v51 }
 0x194   : > { %v835_v55 = vmax.f32 %v811_v52, 0.0  ;;  %v1457_v52 = vld [vmem:[%s1933_s9 + $0x8] sm:$0xff] }
 0x195   : > { %1211 = vmatpush.bf16.msra.mxu3 %v1457_v52 }
 0x199   : > { %v812_v53 = vpop.f32.mrf.mxu0 }
 0x19a   : > { %v813_v54 = vadd.f32 %v1732_v50, %v812_v53 }
 0x19c   : > { %v836_v56 = vmax.f32 %v813_v54, 0.0 }
 0x19d   : > { %v923_v26 = vpop.f32.mrf.mxu1 }
 0x19e   : > { %v846_v57 = vpack.c.bf16 %v836_v56, %v835_v55  ;;  %v924_v59 = vadd.f32 %v1778_v25, %v923_v26  ;;  %v1456_v56 = vld [vmem:[%s1933_s9] sm:$0xff] }
 0x19f   : > { %1212 = vmatpush.bf16.msra.mxu3 %v1456_v56 }
 0x1a0   : > { %1396 = vmatmul.msk.bf16.gmra.mxu1 %vm730_vm0, %v846_v57  ;;  %v972_v63 = vmax.f32 %v924_v59, 0.0 }
 0x1a1   : > { %v815_v58 = vpop.f32.mrf.mxu0 }
 0x1a2   : > { %v816_v61 = vadd.f32 %v1732_v50, %v815_v58 }
 0x1a4   : > { %v837_v1 = vmax.f32 %v816_v61, 0.0 }
 0x1a5   : > { %v925_v60 = vpop.f32.mrf.mxu1 }
 0x1a6   : > { %v926_v62 = vadd.f32 %v1778_v25, %v925_v60  ;;  %v847_v4 = vpack.c.bf16 %v837_v1, %v837_v1 }
 0x1a8   : > { %v973_v0 = vmax.f32 %v926_v62, 0.0 }
 0x1a9   : > { %v817_v32 = vpop.f32.mrf.mxu0 }
 0x1aa   : > { %v991_v2 = vpack.c.bf16 %v973_v0, %v972_v63 }
 0x1ac   : > { %1414 = vmatmul.msk.bf16.vlgmr.msra.gmra.mxu2 %vm730_vm0, %v991_v2  ;;  %v1820_v2 = vld [vmem:[%s1932_s8] ss:$0 sm:$0xff] }
 0x1ad   : > { %v928_v3 = vpop.f32.mrf.mxu1 }
 0x1ae   : > { %v929_v5 = vadd.f32 %v1778_v25, %v928_v3 }
 0x1b0   : > { %1397 = vmatmul.msk.bf16.gmra.mxu1 %vm730_vm0, %v847_v4  ;;  %v974_v8 = vmax.f32 %v929_v5, 0.0 }
 0x1b5   : > { %v930_v6 = vpop.f32.mrf.mxu1 }
 0x1b6   : > { %v931_v7 = vadd.f32 %v1778_v25, %v930_v6 }
 0x1b8   : > { %v975_v50 = vmax.f32 %v931_v7, 0.0 }
 0x1ba   : > { %v992_v9 = vpack.c.bf16 %v975_v50, %v974_v8 }
 0x1bc   : > { %1415 = vmatmul.msk.bf16.gmra.mxu2 %vm730_vm0, %v992_v9 }
 0x1bd   : > { %v933_v10 = vpop.f32.mrf.mxu1 }
 0x1be   : > { %v934_v11 = vadd.f32 %v1778_v25, %v933_v10 }
 0x1c0   : > { %v976_v14 = vmax.f32 %v934_v11, 0.0 }
 0x1c5   : > { %v935_v12 = vpop.f32.mrf.mxu1 }
 0x1c6   : > { %v936_v13 = vadd.f32 %v1778_v25, %v935_v12 }
 0x1c8   : > { %v977_v15 = vmax.f32 %v936_v13, 0.0 }
 0x1ca   : > { %v993_v16 = vpack.c.bf16 %v977_v15, %v976_v14 }
 0x1cc   : > { %1416 = vmatmul.msk.bf16.gmra.mxu2 %vm730_vm0, %v993_v16 }
 0x1cd   : > { %v938_v17 = vpop.f32.mrf.mxu1 }
 0x1ce   : > { %v939_v18 = vadd.f32 %v1778_v25, %v938_v17 }
 0x1d0   : > { %v978_v21 = vmax.f32 %v939_v18, 0.0 }
 0x1d5   : > { %v940_v19 = vpop.f32.mrf.mxu1 }
 0x1d6   : > { %v941_v20 = vadd.f32 %v1778_v25, %v940_v19 }
 0x1d8   : > { %v979_v22 = vmax.f32 %v941_v20, 0.0 }
 0x1da   : > { %v994_v23 = vpack.c.bf16 %v979_v22, %v978_v21 }
 0x1dc   : > { %1417 = vmatmul.msk.bf16.gmra.mxu2 %vm730_vm0, %v994_v23 }
 0x1dd   : > { %v943_v24 = vpop.f32.mrf.mxu1 }
 0x1de   : > { %v944_v27 = vadd.f32 %v1778_v25, %v943_v24 }
 0x1e0   : > { %v980_v30 = vmax.f32 %v944_v27, 0.0 }
 0x1e5   : > { %v945_v28 = vpop.f32.mrf.mxu1 }
 0x1e6   : > { %v946_v29 = vadd.f32 %v1778_v25, %v945_v28 }
 0x1e8   : > { %v981_v31 = vmax.f32 %v946_v29, 0.0 }
 0x1ea   : > { %v995_v33 = vpack.c.bf16 %v981_v31, %v980_v30 }
 0x1ec   : > { %1418 = vmatmul.msk.bf16.gmra.mxu2 %vm730_vm0, %v995_v33 }
 0x1ed   : > { %v948_v34 = vpop.f32.mrf.mxu1 }
 0x1ee   : > { %v949_v35 = vadd.f32 %v1778_v25, %v948_v34 }
 0x1f0   : > { %v982_v38 = vmax.f32 %v949_v35, 0.0 }
 0x1f5   : > { %v950_v36 = vpop.f32.mrf.mxu1 }
 0x1f6   : > { %v951_v37 = vadd.f32 %v1778_v25, %v950_v36 }
 0x1f8   : > { %v983_v39 = vmax.f32 %v951_v37, 0.0 }
 0x1fa   : > { %v996_v40 = vpack.c.bf16 %v983_v39, %v982_v38 }
 0x1fc   : > { %1419 = vmatmul.msk.bf16.gmra.mxu2 %vm730_vm0, %v996_v40 }
 0x1fd   : > { %v953_v41 = vpop.f32.mrf.mxu1 }
 0x1fe   : > { %v954_v42 = vadd.f32 %v1778_v25, %v953_v41 }
 0x200   : > { %v984_v45 = vmax.f32 %v954_v42, 0.0 }
 0x205   : > { %v955_v43 = vpop.f32.mrf.mxu1 }
 0x206   : > { %v956_v44 = vadd.f32 %v1778_v25, %v955_v43 }
 0x208   : > { %v985_v46 = vmax.f32 %v956_v44, 0.0 }
 0x20a   : > { %v997_v47 = vpack.c.bf16 %v985_v46, %v984_v45 }
 0x20c   : > { %1420 = vmatmul.msk.bf16.gmra.mxu2 %vm730_vm0, %v997_v47 }
 0x20d   : > { %v958_v48 = vpop.f32.mrf.mxu1 }
 0x20e   : > { %v959_v49 = vadd.f32 %v1778_v25, %v958_v48 }
 0x210   : > { %v986_v54 = vmax.f32 %v959_v49, 0.0 }
 0x215   : > { %v960_v51 = vpop.f32.mrf.mxu1 }
 0x216   : > { %v961_v53 = vadd.f32 %v1778_v25, %v960_v51 }
 0x218   : > { %v987_v55 = vmax.f32 %v961_v53, 0.0 }
 0x21a   : > { %v998_v26 = vpack.c.bf16 %v987_v55, %v986_v54 }
 0x21c   : > { %1421 = vmatmul.msk.bf16.gmra.mxu2 %vm730_vm0, %v998_v26 }
 0x21d   : > { %v963_v57 = vpop.f32.mrf.mxu1 }
 0x21e   : > { %v964_v58 = vadd.f32 %v1778_v25, %v963_v57 }
 0x220   : > { %v988_v61 = vmax.f32 %v964_v58, 0.0 }
 0x225   : > { %v965_v59 = vpop.f32.mrf.mxu1 }
 0x226   : > { %v966_v60 = vadd.f32 %v1778_v25, %v965_v59 }
 0x228   : > { %v989_v62 = vmax.f32 %v966_v60, 0.0 }
 0x22a   : > { %v999_v63 = vpack.c.bf16 %v989_v62, %v988_v61 }
 0x22c   : > { %1422 = vmatmul.msk.bf16.gmra.mxu2 %vm730_vm0, %v999_v63 }
 0x22d   : > { %v968_v0 = vpop.f32.mrf.mxu1 }
 0x22e   : > { %v969_v1 = vadd.f32 %v1778_v25, %v968_v0 }
 0x22f   : > { %v1076_v32 = vpop.f32.mrf.mxu2 }
 0x230   : > { %v990_v4 = vmax.f32 %v969_v1, 0.0  ;;  %v1077_v5 = vadd.f32 %v1820_v2, %v1076_v32 }
 0x232   : > { %v1000_v8 = vpack.c.bf16 %v990_v4, %v990_v4  ;;  %v1125_v50 = vmax.f32 %v1077_v5, 0.0  ;;  %v1853_v5 = vld [vmem:[%s1934_s10] ss:$0 sm:$0xff] }
 0x235   : > { %v970_v3 = vpop.f32.mrf.mxu1 }
 0x237   : > { %v1078_v6 = vpop.f32.mrf.mxu2 }
 0x238   : > { %v1079_v7 = vadd.f32 %v1820_v2, %v1078_v6 }
 0x23a   : > { %v1126_v9 = vmax.f32 %v1079_v7, 0.0 }
 0x23c   : > { %v1144_v10 = vpack.c.bf16 %v1126_v9, %v1125_v50  ;;  %1423 = vmatmul.msk.bf16.gmra.mxu2 %vm730_vm0, %v1000_v8 }
 0x23e   : > { %1432 = vmatmul.msk.bf16.vlgmr.msra.gmra.mxu3 %vm1174_vm1, %v1144_v10 }
 0x23f   : > { %v1081_v25 = vpop.f32.mrf.mxu2 }
 0x240   : > { %v1082_v11 = vadd.f32 %v1820_v2, %v1081_v25 }
 0x242   : > { %v1127_v14 = vmax.f32 %v1082_v11, 0.0 }
 0x247   : > { %v1083_v12 = vpop.f32.mrf.mxu2 }
 0x248   : > { %v1084_v13 = vadd.f32 %v1820_v2, %v1083_v12 }
 0x24a   : > { %v1128_v15 = vmax.f32 %v1084_v13, 0.0 }
 0x24c   : > { %v1145_v16 = vpack.c.bf16 %v1128_v15, %v1127_v14 }
 0x24e   : > { %1433 = vmatmul.msk.bf16.gmra.mxu3 %vm1174_vm1, %v1145_v16 }
 0x24f   : > { %v1086_v17 = vpop.f32.mrf.mxu2 }
 0x250   : > { %v1087_v18 = vadd.f32 %v1820_v2, %v1086_v17 }
 0x252   : > { %v1129_v21 = vmax.f32 %v1087_v18, 0.0 }
 0x257   : > { %v1088_v19 = vpop.f32.mrf.mxu2 }
 0x258   : > { %v1089_v20 = vadd.f32 %v1820_v2, %v1088_v19 }
 0x25a   : > { %v1130_v22 = vmax.f32 %v1089_v20, 0.0 }
 0x25c   : > { %v1146_v23 = vpack.c.bf16 %v1130_v22, %v1129_v21 }
 0x25e   : > { %1434 = vmatmul.msk.bf16.gmra.mxu3 %vm1174_vm1, %v1146_v23 }
 0x25f   : > { %v1091_v24 = vpop.f32.mrf.mxu2 }
 0x260   : > { %v1092_v27 = vadd.f32 %v1820_v2, %v1091_v24 }
 0x262   : > { %v1131_v30 = vmax.f32 %v1092_v27, 0.0 }
 0x267   : > { %v1093_v28 = vpop.f32.mrf.mxu2 }
 0x268   : > { %v1094_v29 = vadd.f32 %v1820_v2, %v1093_v28 }
 0x26a   : > { %v1132_v31 = vmax.f32 %v1094_v29, 0.0 }
 0x26c   : > { %v1147_v33 = vpack.c.bf16 %v1132_v31, %v1131_v30 }
 0x26e   : > { %1435 = vmatmul.msk.bf16.gmra.mxu3 %vm1174_vm1, %v1147_v33 }
 0x26f   : > { %v1096_v34 = vpop.f32.mrf.mxu2 }
 0x270   : > { %v1097_v35 = vadd.f32 %v1820_v2, %v1096_v34 }
 0x272   : > { %v1133_v38 = vmax.f32 %v1097_v35, 0.0 }
 0x277   : > { %v1098_v36 = vpop.f32.mrf.mxu2 }
 0x278   : > { %v1099_v37 = vadd.f32 %v1820_v2, %v1098_v36 }
 0x27a   : > { %v1134_v39 = vmax.f32 %v1099_v37, 0.0 }
 0x27c   : > { %v1148_v40 = vpack.c.bf16 %v1134_v39, %v1133_v38 }
 0x27e   : > { %1436 = vmatmul.msk.bf16.gmra.mxu3 %vm1174_vm1, %v1148_v40 }
 0x27f   : > { %v1101_v41 = vpop.f32.mrf.mxu2 }
 0x280   : > { %v1102_v42 = vadd.f32 %v1820_v2, %v1101_v41 }
 0x282   : > { %v1135_v45 = vmax.f32 %v1102_v42, 0.0 }
 0x287   : > { %v1103_v43 = vpop.f32.mrf.mxu2 }
 0x288   : > { %v1104_v44 = vadd.f32 %v1820_v2, %v1103_v43 }
 0x28a   : > { %v1136_v46 = vmax.f32 %v1104_v44, 0.0 }
 0x28c   : > { %v1149_v47 = vpack.c.bf16 %v1136_v46, %v1135_v45 }
 0x28e   : > { %1437 = vmatmul.msk.bf16.gmra.mxu3 %vm1174_vm1, %v1149_v47 }
 0x28f   : > { %v1106_v48 = vpop.f32.mrf.mxu2 }
 0x290   : > { %v1107_v49 = vadd.f32 %v1820_v2, %v1106_v48 }
 0x292   : > { %v1137_v53 = vmax.f32 %v1107_v49, 0.0 }
 0x297   : > { %v1108_v51 = vpop.f32.mrf.mxu2 }
 0x298   : > { %v1109_v52 = vadd.f32 %v1820_v2, %v1108_v51 }
 0x29a   : > { %v1138_v54 = vmax.f32 %v1109_v52, 0.0 }
 0x29c   : > { %v1150_v55 = vpack.c.bf16 %v1138_v54, %v1137_v53 }
 0x29e   : > { %1438 = vmatmul.msk.bf16.gmra.mxu3 %vm1174_vm1, %v1150_v55 }
 0x29f   : > { %v1111_v56 = vpop.f32.mrf.mxu2 }
 0x2a0   : > { %v1112_v26 = vadd.f32 %v1820_v2, %v1111_v56 }
 0x2a2   : > { %v1139_v59 = vmax.f32 %v1112_v26, 0.0 }
 0x2a7   : > { %v1113_v57 = vpop.f32.mrf.mxu2 }
 0x2a8   : > { %v1114_v58 = vadd.f32 %v1820_v2, %v1113_v57 }
 0x2aa   : > { %v1140_v60 = vmax.f32 %v1114_v58, 0.0 }
 0x2ac   : > { %v1151_v61 = vpack.c.bf16 %v1140_v60, %v1139_v59 }
 0x2ae   : > { %1439 = vmatmul.msk.bf16.gmra.mxu3 %vm1174_vm1, %v1151_v61 }
 0x2af   : > { %v1116_v62 = vpop.f32.mrf.mxu2 }
 0x2b0   : > { %v1117_v63 = vadd.f32 %v1820_v2, %v1116_v62 }
 0x2b2   : > { %v1141_v1 = vmax.f32 %v1117_v63, 0.0 }
 0x2b7   : > { %v1118_v0 = vpop.f32.mrf.mxu2 }
 0x2b8   : > { %v1119_v32 = vadd.f32 %v1820_v2, %v1118_v0 }
 0x2ba   : > { %v1142_v3 = vmax.f32 %v1119_v32, 0.0 }
 0x2bc   : > { %v1152_v4 = vpack.c.bf16 %v1142_v3, %v1141_v1 }
 0x2be   : > { %1440 = vmatmul.msk.bf16.gmra.mxu3 %vm1174_vm1, %v1152_v4 }
 0x2bf   : > { %v1121_v6 = vpop.f32.mrf.mxu2 }
 0x2c0   : > { %v1122_v50 = vadd.f32 %v1820_v2, %v1121_v6 }
 0x2c1   : > { %v1214_v7 = vpop.f32.mrf.mxu3 }
 0x2c2   : > { %v1215_v8 = vadd.f32 %v1853_v5, %v1214_v7  ;;  %v1143_v10 = vmax.f32 %v1122_v50, 0.0 }
 0x2c4   : > { %1264 = vst.msk [vmem:[%s1860_s18] sm:$0xff] %vm1263_vm2, %v1215_v8  ;;  %v1153_v12 = vpack.c.bf16 %v1143_v10, %v1143_v10 }
 0x2c7   : > { %v1123_v9 = vpop.f32.mrf.mxu2 }
 0x2c9   : > { %v1216_v25 = vpop.f32.mrf.mxu3 }
 0x2ca   : > { %v1217_v11 = vadd.f32 %v1853_v5, %v1216_v25 }
 0x2cc   : > { %1265 = vst.msk [vmem:[%s1860_s18 + $0x8] sm:$0xff] %vm1263_vm2, %v1217_v11 }
 0x2ce   : > { %1441 = vmatmul.msk.bf16.gmra.mxu3 %vm1174_vm1, %v1153_v12 }
 0x2d1   : > { %v1219_v13 = vpop.f32.mrf.mxu3 }
 0x2d2   : > { %v1220_v14 = vadd.f32 %v1853_v5, %v1219_v13 }
 0x2d4   : > { %1266 = vst.msk [vmem:[%s1860_s18 + $0x10] sm:$0xff] %vm1263_vm2, %v1220_v14 }
 0x2d9   : > { %v1221_v2 = vpop.f32.mrf.mxu3 }
 0x2da   : > { %v1222_v15 = vadd.f32 %v1853_v5, %v1221_v2 }
 0x2dc   : > { %1267 = vst.msk [vmem:[%s1860_s18 + $0x18] sm:$0xff] %vm1263_vm2, %v1222_v15 }
 0x2e1   : > { %v1224_v16 = vpop.f32.mrf.mxu3 }
 0x2e2   : > { %v1225_v17 = vadd.f32 %v1853_v5, %v1224_v16 }
 0x2e4   : > { %1268 = vst.msk [vmem:[%s1860_s18 + $0x20] sm:$0xff] %vm1263_vm2, %v1225_v17 }
 0x2e9   : > { %v1226_v18 = vpop.f32.mrf.mxu3 }
 0x2ea   : > { %v1227_v19 = vadd.f32 %v1853_v5, %v1226_v18 }
 0x2ec   : > { %1269 = vst.msk [vmem:[%s1860_s18 + $0x28] sm:$0xff] %vm1263_vm2, %v1227_v19 }
 0x2f1   : > { %v1229_v20 = vpop.f32.mrf.mxu3 }
 0x2f2   : > { %v1230_v21 = vadd.f32 %v1853_v5, %v1229_v20 }
 0x2f4   : > { %1270 = vst.msk [vmem:[%s1860_s18 + $0x30] sm:$0xff] %vm1263_vm2, %v1230_v21 }
 0x2f9   : > { %v1231_v22 = vpop.f32.mrf.mxu3 }
 0x2fa   : > { %v1232_v23 = vadd.f32 %v1853_v5, %v1231_v22 }
 0x2fc   : > { %1271 = vst.msk [vmem:[%s1860_s18 + $0x38] sm:$0xff] %vm1263_vm2, %v1232_v23 }
 0x301   : > { %v1234_v24 = vpop.f32.mrf.mxu3 }
 0x302   : > { %v1235_v27 = vadd.f32 %v1853_v5, %v1234_v24 }
 0x304   : > { %1272 = vst.msk [vmem:[%s1860_s18 + $0x40] sm:$0xff] %vm1263_vm2, %v1235_v27 }
 0x309   : > { %v1236_v28 = vpop.f32.mrf.mxu3 }
 0x30a   : > { %v1237_v29 = vadd.f32 %v1853_v5, %v1236_v28 }
 0x30c   : > { %1273 = vst.msk [vmem:[%s1860_s18 + $0x48] sm:$0xff] %vm1263_vm2, %v1237_v29 }
 0x311   : > { %v1239_v30 = vpop.f32.mrf.mxu3 }
 0x312   : > { %v1240_v31 = vadd.f32 %v1853_v5, %v1239_v30 }
 0x314   : > { %1274 = vst.msk [vmem:[%s1860_s18 + $0x50] sm:$0xff] %vm1263_vm2, %v1240_v31 }
 0x319   : > { %v1241_v33 = vpop.f32.mrf.mxu3 }
 0x31a   : > { %v1242_v34 = vadd.f32 %v1853_v5, %v1241_v33 }
 0x31c   : > { %1275 = vst.msk [vmem:[%s1860_s18 + $0x58] sm:$0xff] %vm1263_vm2, %v1242_v34 }
 0x321   : > { %v1244_v35 = vpop.f32.mrf.mxu3 }
 0x322   : > { %v1245_v36 = vadd.f32 %v1853_v5, %v1244_v35 }
 0x324   : > { %1276 = vst.msk [vmem:[%s1860_s18 + $0x60] sm:$0xff] %vm1263_vm2, %v1245_v36 }
 0x329   : > { %v1246_v37 = vpop.f32.mrf.mxu3 }
 0x32a   : > { %v1247_v38 = vadd.f32 %v1853_v5, %v1246_v37 }
 0x32c   : > { %1277 = vst.msk [vmem:[%s1860_s18 + $0x68] sm:$0xff] %vm1263_vm2, %v1247_v38 }
 0x331   : > { %v1249_v39 = vpop.f32.mrf.mxu3 }
 0x332   : > { %v1250_v40 = vadd.f32 %v1853_v5, %v1249_v39 }
 0x334   : > { %1278 = vst.msk [vmem:[%s1860_s18 + $0x70] sm:$0xff] %vm1263_vm2, %v1250_v40 }
 0x339   : > { %v1251_v41 = vpop.f32.mrf.mxu3 }
 0x33a   : > { %v1252_v42 = vadd.f32 %v1853_v5, %v1251_v41 }
 0x33c   : > { %1279 = vst.msk [vmem:[%s1860_s18 + $0x78] sm:$0xff] %vm1263_vm2, %v1252_v42 }
 0x341   : > { %v1254_v43 = vpop.f32.mrf.mxu3 }
 0x342   : > { %v1255_v44 = vadd.f32 %v1853_v5, %v1254_v43 }
 0x344   : > { %1280 = vst.msk [vmem:[%s1860_s18 + $0x80] sm:$0xff] %vm1263_vm2, %v1255_v44 }
 0x349   : > { %v1256_v45 = vpop.f32.mrf.mxu3 }
 0x34a   : > { %v1257_v46 = vadd.f32 %v1853_v5, %v1256_v45 }
 0x34c   : > { %1281 = vst.msk [vmem:[%s1860_s18 + $0x88] sm:$0xff] %vm1263_vm2, %v1257_v46 }
 0x351   : > { %v1259_v47 = vpop.f32.mrf.mxu3 }
 0x352   : > { %v1260_v48 = vadd.f32 %v1853_v5, %v1259_v47 }
 0x354   : > { %1282 = vst.msk [vmem:[%s1860_s18 + $0x90] sm:$0xff] %vm1263_vm2, %v1260_v48 }
 0x359   : > { %v1261_v49 = vpop.f32.mrf.mxu3 }
 0x35a PF: > { %s21_s17 = sadd.s32 1, %s1503_s17  }
 0x35b   : > { %p18_p4 = scmp.ge.s32.totalorder %s21_s17, 4  }
 0x35d   :  { %20 = sbr.rel (!%p18_p4) target bundleno = 1 (0x1), region = 94 }

// kernel: tpu_custom_call.1
= control target key start
LH: loop header
LB: loop body
LE: loop exit
PB: predicated region body
PF: predicated region fallthrough
CT: control target
= control target key end

     0   :  { %s1567_s17 = smov 0   ;;  %s1924_s0 = inlined_call_operand.vmem [shape: f32[304,2], index: 0, kind: input, shape index: {}]   ;;  %s1925_s1 = inlined_call_operand.vmem [shape: f32[2,64], index: 1, kind: input, shape index: {}]   ;;  %s1926_s2 = inlined_call_operand.vmem [shape: f32[1,64], index: 2, kind: input, shape index: {}]   ;;  %s1927_s3 = inlined_call_operand.vmem [shape: bf16[64,64], index: 3, kind: input, shape index: {}]   ;;  %s1928_s4 = inlined_call_operand.vmem [shape: f32[1,64], index: 4, kind: input, shape index: {}]   ;;  %s1929_s5 = inlined_call_operand.vmem [shape: bf16[64,64], index: 5, kind: input, shape index: {}]   ;;  %s1930_s6 = inlined_call_operand.vmem [shape: f32[1,64], index: 6, kind: input, shape index: {}]   ;;  %s1931_s7 = inlined_call_operand.vmem [shape: bf16[64,32], index: 7, kind: input, shape index: {}]   ;;  %s1932_s8 = inlined_call_operand.vmem [shape: f32[1,32], index: 8, kind: input, shape index: {}]   ;;  %s1933_s9 = inlined_call_operand.vmem [shape: bf16[32,8], index: 9, kind: input, shape index: {}]   ;;  %s1934_s10 = inlined_call_operand.vmem [shape: f32[1,8], index: 10, kind: input, shape index: {}]   ;;  %s1935_s11 = inlined_call_operand.vmem [shape: f32[304,8], index: 11, kind: output, shape index: {}]  }
   0x1 LB: > { %s1339_s18 = sadd.s32 4294967295, %s1503_s17   ;;  %p1343_p0 = scmp.ge.s32.totalorder %s1503_s17, 1  ;;  %s1503_s17 = sphi %s1567_s17, %s21_s17  }
   0x2   : > { %p338_p1 = scmp.lt.s32.totalorder %s1503_s17, 3 }
   0x4   : > { %p339_p2 = pnand %p1343_p0, %p338_p1 }
   0x5   : > { %s378_s19 = smul.u32 (!%p339_p2), 19, %s1339_s18 }
   0x6   : > { %342 = sbr.rel (%p339_p2) target bundleno = 858 (0x35a), region = 64 }
   0x7   : > { %p379_p3 = scmp.lt.s32.totalorder (!%p339_p2), %s378_s19, 37 }
   0xb   : > { %v1505_v0 = vmov 1   ;;  %v1506_v1 = vmov 0   ;;  %s1937_s19 = smov (!%p379_p3, %s378_s19), 37  ;;  %v1447_v17 = vld [vmem:[%s1927_s3 + $0x18] sm:$0xff]  ;;  %v1446_v20 = vld [vmem:[%s1927_s3 + $0x10] sm:$0xff]  ;;  %v1445_v21 = vld [vmem:[%s1927_s3 + $0x8] sm:$0xff] }
   0xc   : > { %1469 = vset.pattern.permute.xlu1 %v1505_v0  ;;  %1468 = vset.pattern.permute.xlu0 %v1506_v1  ;;  %s1344_s20 = sshll.u32 %s1937_s19, 3  ;;  %v1444_v23 = vld [vmem:[%s1927_s3] sm:$0xff]  ;;  %vm730_vm0 = vcmask 523264   ;;  %vm1174_vm1 = vcmask 261120   ;;  %vm1263_vm2 = vcmask 64512  }
   0xd   : > { %1470 = vset.pattern.permute.xlu2 %v1506_v1  ;;  %s1586_s23 = scalar_lea.vmem %s1924_s0, %s1344_s20  ;;  %765 = vmatpush.bf16.msra.mxu0 %v1447_v17  ;;  %v1641_v25 = vld [vmem:[%s1925_s1] ss:$0 sm:$0xff]  ;;  %v1646_v26 = vld [vmem:[%s1925_s1 + $0x1] ss:$0 sm:$0xff]  ;;  %s1860_s18 = scalar_lea.vmem %s1935_s11, %s1344_s20 }
   0xe   : > { %v391_v2 = vld [vmem:[%s1586_s23] sm:$0xff]  ;;  %v393_v3 = vld [vmem:[%s1586_s23 + $0x10] sm:$0xff]  ;;  %v392_v4 = vld [vmem:[%s1586_s23 + $0x8] sm:$0xff] }
   0xf   : > { %528 = vperm.xlu1 %1469, %v391_v2   ;;  %413 = vperm.xlu0 %1468, %v391_v2   ;;  %v394_v5 = vld [vmem:[%s1586_s23 + $0x18] sm:$0xff]  ;;  %v395_v6 = vld [vmem:[%s1586_s23 + $0x20] sm:$0xff]  ;;  %v396_v7 = vld [vmem:[%s1586_s23 + $0x28] sm:$0xff] }
  0x10   : > { %423 = vperm.xlu2 %1470, %v393_v3   ;;  %v397_v8 = vld [vmem:[%s1586_s23 + $0x30] sm:$0xff]  ;;  %v398_v9 = vld [vmem:[%s1586_s23 + $0x38] sm:$0xff]  ;;  %v400_v10 = vld [vmem:[%s1586_s23 + $0x48] sm:$0xff] }
  0x11   : > { %v399_v11 = vld [vmem:[%s1586_s23 + $0x40] sm:$0xff]  ;;  %v401_v12 = vld [vmem:[%s1586_s23 + $0x50] sm:$0xff]  ;;  %v404_v13 = vld [vmem:[%s1586_s23 + $0x68] sm:$0xff]  ;;  %766 = vmatpush.bf16.msra.mxu0 %v1446_v20 }
  0x12   : > { %v402_v14 = vld [vmem:[%s1586_s23 + $0x58] sm:$0xff]  ;;  %v405_v15 = vld [vmem:[%s1586_s23 + $0x70] sm:$0xff]  ;;  %v403_v16 = vld [vmem:[%s1586_s23 + $0x60] sm:$0xff] }
  0x13   : > { %v408_v18 = vld [vmem:[%s1586_s23 + $0x88] sm:$0xff]  ;;  %v406_v19 = vld [vmem:[%s1586_s23 + $0x78] sm:$0xff]  ;;  %v407_v22 = vld [vmem:[%s1586_s23 + $0x80] sm:$0xff] }
  0x14   : > { %v409_v24 = vld [vmem:[%s1586_s23 + $0x90] sm:$0xff]  ;;  %v1653_v32 = vld [vmem:[%s1926_s2] ss:$0 sm:$0xff] }
  0x15   : > { %767 = vmatpush.bf16.msra.mxu0 %v1445_v21 }
  0x17   : > { %532 = vperm.xlu1 %1469, %v392_v4   ;;  %418 = vperm.xlu0 %1468, %v392_v4  }
  0x18   : > { %428 = vperm.xlu2 %1470, %v394_v5  }
  0x19   : > { %768 = vmatpush.bf16.msra.mxu0 %v1444_v23 }
  0x1f   : > { %540 = vperm.xlu1 %1469, %v394_v5   ;;  %1471 = vset.pattern.permute.xlu0 %v1505_v0 }
  0x20   : > { %536 = vperm.xlu0 %1471, %v393_v3   ;;  %433 = vperm.xlu2 %1470, %v395_v6  }
  0x27   : > { %1472 = vset.pattern.permute.xlu1 %v1506_v1 }
  0x28   : > { %438 = vperm.xlu1 %1472, %v396_v7   ;;  %548 = vperm.xlu0 %1471, %v396_v7  }
  0x29   : > { %1473 = vset.pattern.permute.xlu2 %v1505_v0 }
  0x2a   : > { %544 = vperm.xlu2 %1473, %v395_v6  }
  0x30   : > { %443 = vperm.xlu1 %1472, %v397_v8   ;;  %552 = vperm.xlu0 %1471, %v397_v8  }
  0x32   : > { %1474 = vset.pattern.permute.xlu2 %v1506_v1 }
  0x33   : > { %448 = vperm.xlu2 %1474, %v398_v9  }
  0x38   : > { %1475 = vset.pattern.permute.xlu1 %v1505_v0  ;;  %1476 = vset.pattern.permute.xlu0 %v1506_v1 }
  0x39   : > { %556 = vperm.xlu1 %1475, %v398_v9   ;;  %458 = vperm.xlu0 %1476, %v400_v10  }
  0x3b   : > { %453 = vperm.xlu2 %1474, %v399_v11  }
  0x41   : > { %560 = vperm.xlu1 %1475, %v399_v11   ;;  %1480 = vset.pattern.permute.xlu0 %v1505_v0 }
  0x42   : > { %568 = vperm.xlu0 %1480, %v401_v12  }
  0x43   : > { %1477 = vset.pattern.permute.xlu2 %v1505_v0 }
  0x44   : > { %564 = vperm.xlu2 %1477, %v400_v10  }
  0x49   : > { %1478 = vset.pattern.permute.xlu1 %v1506_v1 }
  0x4a   : > { %463 = vperm.xlu1 %1478, %v401_v12   ;;  %580 = vperm.xlu0 %1480, %v404_v13  }
  0x4c   : > { %1479 = vset.pattern.permute.xlu2 %v1506_v1 }
  0x4d   : > { %468 = vperm.xlu2 %1479, %v402_v14  }
  0x52   : > { %1481 = vset.pattern.permute.xlu1 %v1505_v0  ;;  %584 = vperm.xlu0 %1480, %v405_v15  }
  0x53   : > { %572 = vperm.xlu1 %1481, %v402_v14  }
  0x55   : > { %473 = vperm.xlu2 %1479, %v403_v16  }
  0x5a   : > { %1486 = vset.pattern.permute.xlu0 %v1506_v1 }
  0x5b   : > { %1482 = vset.pattern.permute.xlu1 %v1506_v1  ;;  %498 = vperm.xlu0 %1486, %v408_v18  }
  0x5c   : > { %478 = vperm.xlu1 %1482, %v404_v13  }
  0x5d   : > { %1483 = vset.pattern.permute.xlu2 %v1505_v0 }
  0x5e   : > { %576 = vperm.xlu2 %1483, %v403_v16  }
  0x63   : > { %1489 = vset.pattern.permute.xlu0 %v1505_v0 }
  0x64   : > { %483 = vperm.xlu1 %1482, %v405_v15  }
  0x66   : > { %1484 = vset.pattern.permute.xlu2 %v1506_v1 }
  0x67   : > { %488 = vperm.xlu2 %1484, %v406_v19  }
  0x6a   : > { %v424_v29 = vpop.permute.xlu2 %423 }
  0x6b   : > { %v509_v50 = vmul.f32 %v1641_v25, %v424_v29 }
  0x6c   : > { %1485 = vset.pattern.permute.xlu1 %v1505_v0 }
  0x6d   : > { %588 = vperm.xlu1 %1485, %v406_v19  }
  0x6f   : > { %493 = vperm.xlu2 %1484, %v407_v22  }
  0x72   : > { %v429_v40 = vpop.permute.xlu2 %428 }
  0x73   : > { %v510_v45 = vmul.f32 %v1641_v25, %v429_v40 }
  0x75   : > { %592 = vperm.xlu1 %1485, %v407_v22  }
  0x77   : > { %1487 = vset.pattern.permute.xlu2 %v1505_v0 }
  0x78   : > { %596 = vperm.xlu2 %1487, %v408_v18  }
  0x7a   : > { %v434_v53 = vpop.permute.xlu2 %433 }
  0x7b   : > { %v511_v0 = vmul.f32 %v1641_v25, %v434_v53 }
  0x7d   : > { %1488 = vset.pattern.permute.xlu1 %v1506_v1 }
  0x7e   : > { %503 = vperm.xlu1 %1488, %v409_v24  }
  0x80   : > { %600 = vperm.xlu2 %1487, %v409_v24  }
  0x81   : > { %v529_v27 = vpop.permute.xlu1 %528  ;;  %v414_v28 = vpop.permute.xlu0 %413 }
  0x82   : > { %v604_v30 = vmul.f32 %v1646_v26, %v529_v27  ;;  %v507_v31 = vmul.f32 %v1641_v25, %v414_v28 }
  0x84   : > { %v623_v33 = vadd.f32 %v604_v30, %v507_v31  ;;  %v545_v60 = vpop.permute.xlu2 %544 }
  0x85   : > { %v608_v1 = vmul.f32 %v1646_v26, %v545_v60 }
  0x86   : > { %v646_v38 = vadd.f32 %v1653_v32, %v623_v33 }
  0x87   : > { %v627_v4 = vadd.f32 %v608_v1, %v511_v0 }
  0x88   : > { %v665_v42 = vmax.f32 %v646_v38, 0.0 }
  0x89   : > { %v533_v34 = vpop.permute.xlu1 %532  ;;  %v419_v35 = vpop.permute.xlu0 %418  ;;  %v650_v7 = vadd.f32 %v1653_v32, %v627_v4 }
  0x8a   : > { %v605_v36 = vmul.f32 %v1646_v26, %v533_v34  ;;  %v508_v37 = vmul.f32 %v1641_v25, %v419_v35 }
  0x8b   : > { %v669_v10 = vmax.f32 %v650_v7, 0.0 }
  0x8c   : > { %v624_v39 = vadd.f32 %v605_v36, %v508_v37 }
  0x8d   : > { %v449_v6 = vpop.permute.xlu2 %448 }
  0x8e   : > { %v647_v41 = vadd.f32 %v1653_v32, %v624_v39  ;;  %v514_v12 = vmul.f32 %v1641_v25, %v449_v6 }
  0x90   : > { %v666_v43 = vmax.f32 %v647_v41, 0.0 }
  0x91   : > { %v541_v44 = vpop.permute.xlu1 %540 }
  0x92   : > { %v607_v46 = vmul.f32 %v1646_v26, %v541_v44  ;;  %v537_v47 = vpop.permute.xlu0 %536  ;;  %v684_v48 = vpack.c.bf16 %v666_v43, %v665_v42 }
  0x93   : > { %v606_v49 = vmul.f32 %v1646_v26, %v537_v47 }
  0x94   : > { %1362 = vmatmul.msk.bf16.vlgmr.msra.gmra.mxu0 %vm730_vm0, %v684_v48  ;;  %v626_v51 = vadd.f32 %v607_v46, %v510_v45 }
  0x95   : > { %v625_v52 = vadd.f32 %v606_v49, %v509_v50  ;;  %v454_v17 = vpop.permute.xlu2 %453 }
  0x96   : > { %v649_v54 = vadd.f32 %v1653_v32, %v626_v51  ;;  %v515_v29 = vmul.f32 %v1641_v25, %v454_v17 }
  0x97   : > { %v648_v55 = vadd.f32 %v1653_v32, %v625_v52 }
  0x98   : > { %v668_v57 = vmax.f32 %v649_v54, 0.0 }
  0x99   : > { %v667_v58 = vmax.f32 %v648_v55, 0.0 }
  0x9a   : > { %v439_v56 = vpop.permute.xlu1 %438  ;;  %v549_v59 = vpop.permute.xlu0 %548 }
  0x9b   : > { %v512_v61 = vmul.f32 %v1641_v25, %v439_v56  ;;  %v609_v62 = vmul.f32 %v1646_v26, %v549_v59  ;;  %v685_v63 = vpack.c.bf16 %v668_v57, %v667_v58 }
  0x9d   : > { %v628_v3 = vadd.f32 %v609_v62, %v512_v61 }
  0x9e   : > { %v565_v24 = vpop.permute.xlu2 %564 }
  0x9f   : > { %v651_v5 = vadd.f32 %v1653_v32, %v628_v3  ;;  %v613_v31 = vmul.f32 %v1646_v26, %v565_v24 }
  0xa1   : > { %v670_v8 = vmax.f32 %v651_v5, 0.0 }
  0xa2   : > { %v444_v2 = vpop.permute.xlu1 %443  ;;  %v553_v11 = vpop.permute.xlu0 %552 }
  0xa3   : > { %v686_v14 = vpack.c.bf16 %v670_v8, %v669_v10  ;;  %v513_v15 = vmul.f32 %v1641_v25, %v444_v2  ;;  %v610_v16 = vmul.f32 %v1646_v26, %v553_v11  ;;  %v1451_v10 = vld [vmem:[%s1929_s5 + $0x18] sm:$0xff] }
  0xa4   : > { %1363 = vmatmul.msk.bf16.gmra.mxu0 %vm730_vm0, %v685_v63  ;;  %918 = vmatpush.bf16.msra.mxu1 %v1451_v10 }
  0xa5   : > { %v629_v19 = vadd.f32 %v610_v16, %v513_v15  ;;  %v1450_v15 = vld [vmem:[%s1929_s5 + $0x10] sm:$0xff] }
  0xa7   : > { %v652_v21 = vadd.f32 %v1653_v32, %v629_v19  ;;  %v469_v40 = vpop.permute.xlu2 %468 }
  0xa8   : > { %v518_v43 = vmul.f32 %v1641_v25, %v469_v40  ;;  %919 = vmatpush.bf16.msra.mxu1 %v1450_v15 }
  0xa9   : > { %v671_v28 = vmax.f32 %v652_v21, 0.0 }
  0xab   : > { %v557_v9 = vpop.permute.xlu1 %556  ;;  %v459_v27 = vpop.permute.xlu0 %458 }
  0xac   : > { %v611_v13 = vmul.f32 %v1646_v26, %v557_v9  ;;  %v516_v33 = vmul.f32 %v1641_v25, %v459_v27 }
  0xae   : > { %v630_v18 = vadd.f32 %v611_v13, %v514_v12  ;;  %v632_v36 = vadd.f32 %v613_v31, %v516_v33 }
  0xaf   : > { %v474_v50 = vpop.permute.xlu2 %473 }
  0xb0   : > { %v653_v20 = vadd.f32 %v1653_v32, %v630_v18  ;;  %v655_v39 = vadd.f32 %v1653_v32, %v632_v36  ;;  %v519_v59 = vmul.f32 %v1641_v25, %v474_v50  ;;  %v1732_v50 = vld [vmem:[%s1928_s4] ss:$0 sm:$0xff] }
  0xb2   : > { %v672_v23 = vmax.f32 %v653_v20, 0.0  ;;  %v674_v42 = vmax.f32 %v655_v39, 0.0  ;;  %v1449_v20 = vld [vmem:[%s1929_s5 + $0x8] sm:$0xff] }
  0xb3   : > { %v561_v22 = vpop.permute.xlu1 %560  ;;  %920 = vmatpush.bf16.msra.mxu1 %v1449_v20 }
  0xb4   : > { %1364 = vmatmul.msk.bf16.gmra.mxu0 %vm730_vm0, %v686_v14  ;;  %v612_v30 = vmul.f32 %v1646_v26, %v561_v22  ;;  %v687_v34 = vpack.c.bf16 %v672_v23, %v671_v28  ;;  %v569_v45 = vpop.permute.xlu0 %568  ;;  %v1448_v23 = vld [vmem:[%s1929_s5] sm:$0xff] }
  0xb5   : > { %v614_v48 = vmul.f32 %v1646_v26, %v569_v45 }
  0xb6   : > { %v631_v35 = vadd.f32 %v612_v30, %v515_v29 }
  0xb7   : > { %921 = vmatpush.bf16.msra.mxu1 %v1448_v23 }
  0xb8   : > { %v654_v38 = vadd.f32 %v1653_v32, %v631_v35  ;;  %v577_v58 = vpop.permute.xlu2 %576 }
  0xb9   : > { %v616_v63 = vmul.f32 %v1646_v26, %v577_v58 }
  0xba   : > { %v673_v41 = vmax.f32 %v654_v38, 0.0 }
  0xbb   : > { %v635_v3 = vadd.f32 %v616_v63, %v519_v59 }
  0xbc   : > { %v464_v37 = vpop.permute.xlu1 %463  ;;  %v688_v49 = vpack.c.bf16 %v674_v42, %v673_v41  ;;  %v581_v60 = vpop.permute.xlu0 %580 }
  0xbd   : > { %v517_v46 = vmul.f32 %v1641_v25, %v464_v37  ;;  %v617_v62 = vmul.f32 %v1646_v26, %v581_v60  ;;  %v658_v5 = vadd.f32 %v1653_v32, %v635_v3 }
  0xbf   : > { %v633_v52 = vadd.f32 %v614_v48, %v517_v46  ;;  %v677_v8 = vmax.f32 %v658_v5, 0.0 }
  0xc1   : > { %v656_v54 = vadd.f32 %v1653_v32, %v633_v52  ;;  %v489_v6 = vpop.permute.xlu2 %488 }
  0xc2   : > { %v522_v12 = vmul.f32 %v1641_v25, %v489_v6 }
  0xc3   : > { %v675_v57 = vmax.f32 %v656_v54, 0.0 }
  0xc4   : > { %1365 = vmatmul.msk.bf16.gmra.mxu0 %vm730_vm0, %v687_v34  ;;  %v585_v11 = vpop.permute.xlu0 %584 }
  0xc5   : > { %v573_v44 = vpop.permute.xlu1 %572  ;;  %v618_v17 = vmul.f32 %v1646_v26, %v585_v11 }
  0xc6   : > { %v615_v47 = vmul.f32 %v1646_v26, %v573_v44 }
  0xc8   : > { %v634_v51 = vadd.f32 %v615_v47, %v518_v43 }
  0xc9   : > { %v494_v18 = vpop.permute.xlu2 %493 }
  0xca   : > { %v657_v53 = vadd.f32 %v1653_v32, %v634_v51  ;;  %v523_v33 = vmul.f32 %v1641_v25, %v494_v18 }
  0xcc   : > { %v676_v56 = vmax.f32 %v657_v53, 0.0 }
  0xcd   : > { %v499_v30 = vpop.permute.xlu0 %498 }
  0xce   : > { %v479_v55 = vpop.permute.xlu1 %478  ;;  %v689_v0 = vpack.c.bf16 %v676_v56, %v675_v57  ;;  %v524_v36 = vmul.f32 %v1641_v25, %v499_v30 }
  0xcf   : > { %v520_v61 = vmul.f32 %v1641_v25, %v479_v55 }
  0xd1   : > { %v636_v2 = vadd.f32 %v617_v62, %v520_v61 }
  0xd2   : > { %v597_v28 = vpop.permute.xlu2 %596 }
  0xd3   : > { %v659_v4 = vadd.f32 %v1653_v32, %v636_v2  ;;  %v621_v34 = vmul.f32 %v1646_v26, %v597_v28 }
  0xd4   : > { %1366 = vmatmul.msk.bf16.gmra.mxu0 %vm730_vm0, %v688_v49 }
  0xd5   : > { %v678_v7 = vmax.f32 %v659_v4, 0.0  ;;  %v640_v39 = vadd.f32 %v621_v34, %v524_v36  ;;  %v1455_v36 = vld [vmem:[%s1931_s7 + $0x18] sm:$0xff] }
  0xd6   : > { %v484_v1 = vpop.permute.xlu1 %483  ;;  %1071 = vmatpush.bf16.msra.mxu2 %v1455_v36 }
  0xd7   : > { %v690_v14 = vpack.c.bf16 %v678_v7, %v677_v8  ;;  %v521_v16 = vmul.f32 %v1641_v25, %v484_v1  ;;  %v663_v41 = vadd.f32 %v1653_v32, %v640_v39 }
  0xd9   : > { %v637_v21 = vadd.f32 %v618_v17, %v521_v16  ;;  %v682_v43 = vmax.f32 %v663_v41, 0.0 }
  0xda   : > { %v601_v44 = vpop.permute.xlu2 %600 }
  0xdb   : > { %v660_v24 = vadd.f32 %v1653_v32, %v637_v21  ;;  %v622_v47 = vmul.f32 %v1646_v26, %v601_v44 }
  0xdd   : > { %v679_v31 = vmax.f32 %v660_v24, 0.0 }
  0xdf   : > { %v589_v9 = vpop.permute.xlu1 %588 }
  0xe0   : > { %v619_v13 = vmul.f32 %v1646_v26, %v589_v9 }
  0xe2   : > { %v638_v19 = vadd.f32 %v619_v13, %v522_v12 }
  0xe4   : > { %1367 = vmatmul.msk.bf16.gmra.mxu0 %vm730_vm0, %v689_v0  ;;  %v661_v22 = vadd.f32 %v1653_v32, %v638_v19 }
  0xe6   : > { %v680_v27 = vmax.f32 %v661_v22, 0.0 }
  0xe7   : > { %v593_v29 = vpop.permute.xlu1 %592 }
  0xe8   : > { %v620_v35 = vmul.f32 %v1646_v26, %v593_v29  ;;  %v691_v37 = vpack.c.bf16 %v680_v27, %v679_v31 }
  0xea   : > { %v639_v38 = vadd.f32 %v620_v35, %v523_v33 }
  0xec   : > { %v662_v40 = vadd.f32 %v1653_v32, %v639_v38 }
  0xee   : > { %v681_v42 = vmax.f32 %v662_v40, 0.0  ;;  %v1454_v40 = vld [vmem:[%s1931_s7 + $0x10] sm:$0xff] }
  0xef   : > { %1072 = vmatpush.bf16.msra.mxu2 %v1454_v40 }
  0xf0   : > { %v504_v45 = vpop.permute.xlu1 %503  ;;  %v692_v49 = vpack.c.bf16 %v682_v43, %v681_v42  ;;  %v1453_v42 = vld [vmem:[%s1931_s7 + $0x8] sm:$0xff]  ;;  %v1452_v43 = vld [vmem:[%s1931_s7] sm:$0xff] }
  0xf1   : > { %v525_v48 = vmul.f32 %v1641_v25, %v504_v45 }
  0xf3   : > { %v641_v51 = vadd.f32 %v622_v47, %v525_v48  ;;  %1073 = vmatpush.bf16.msra.mxu2 %v1453_v42 }
  0xf4   : > { %1368 = vmatmul.msk.bf16.gmra.mxu0 %vm730_vm0, %v690_v14 }
  0xf5   : > { %v664_v54 = vadd.f32 %v1653_v32, %v641_v51 }
  0xf7   : > { %v683_v25 = vmax.f32 %v664_v54, 0.0  ;;  %1074 = vmatpush.bf16.msra.mxu2 %v1452_v43 }
  0xf9   : > { %v693_v59 = vpack.c.bf16 %v683_v25, %v683_v25  ;;  %v1778_v25 = vld [vmem:[%s1930_s6] ss:$0 sm:$0xff] }
 0x104   : > { %1369 = vmatmul.msk.bf16.gmra.mxu0 %vm730_vm0, %v691_v37 }
 0x111   : > { %v770_v46 = vpop.f32.mrf.mxu0 }
 0x112   : > { %v771_v52 = vadd.f32 %v1732_v50, %v770_v46 }
 0x114   : > { %1370 = vmatmul.msk.bf16.gmra.mxu0 %vm730_vm0, %v692_v49  ;;  %v819_v56 = vmax.f32 %v771_v52, 0.0 }
 0x119   : > { %v772_v53 = vpop.f32.mrf.mxu0 }
 0x11a   : > { %v773_v55 = vadd.f32 %v1732_v50, %v772_v53 }
 0x11c   : > { %v820_v26 = vmax.f32 %v773_v55, 0.0 }
 0x11e   : > { %v838_v57 = vpack.c.bf16 %v820_v26, %v819_v56 }
 0x120   : > { %1388 = vmatmul.msk.bf16.vlgmr.msra.gmra.mxu1 %vm730_vm0, %v838_v57 }
 0x121   : > { %v775_v58 = vpop.f32.mrf.mxu0 }
 0x122   : > { %v776_v60 = vadd.f32 %v1732_v50, %v775_v58 }
 0x124   : > { %1371 = vmatmul.msk.bf16.gmra.mxu0 %vm730_vm0, %v693_v59  ;;  %v821_v63 = vmax.f32 %v776_v60, 0.0 }
 0x129   : > { %v777_v61 = vpop.f32.mrf.mxu0 }
 0x12a   : > { %v778_v62 = vadd.f32 %v1732_v50, %v777_v61 }
 0x12c   : > { %v822_v0 = vmax.f32 %v778_v62, 0.0 }
 0x12e   : > { %v839_v32 = vpack.c.bf16 %v822_v0, %v821_v63 }
 0x130   : > { %1389 = vmatmul.msk.bf16.gmra.mxu1 %vm730_vm0, %v839_v32 }
 0x131   : > { %v780_v1 = vpop.f32.mrf.mxu0 }
 0x132   : > { %v781_v2 = vadd.f32 %v1732_v50, %v780_v1 }
 0x134   : > { %v823_v5 = vmax.f32 %v781_v2, 0.0 }
 0x139   : > { %v782_v3 = vpop.f32.mrf.mxu0 }
 0x13a   : > { %v783_v4 = vadd.f32 %v1732_v50, %v782_v3 }
 0x13c   : > { %v824_v6 = vmax.f32 %v783_v4, 0.0 }
 0x13e   : > { %v840_v7 = vpack.c.bf16 %v824_v6, %v823_v5 }
 0x140   : > { %1390 = vmatmul.msk.bf16.gmra.mxu1 %vm730_vm0, %v840_v7 }
 0x141   : > { %v785_v8 = vpop.f32.mrf.mxu0 }
 0x142   : > { %v786_v9 = vadd.f32 %v1732_v50, %v785_v8 }
 0x144   : > { %v825_v12 = vmax.f32 %v786_v9, 0.0 }
 0x149   : > { %v787_v10 = vpop.f32.mrf.mxu0 }
 0x14a   : > { %v788_v11 = vadd.f32 %v1732_v50, %v787_v10 }
 0x14c   : > { %v826_v13 = vmax.f32 %v788_v11, 0.0 }
 0x14e   : > { %v841_v14 = vpack.c.bf16 %v826_v13, %v825_v12 }
 0x150   : > { %1391 = vmatmul.msk.bf16.gmra.mxu1 %vm730_vm0, %v841_v14 }
 0x151   : > { %v790_v15 = vpop.f32.mrf.mxu0 }
 0x152   : > { %v791_v16 = vadd.f32 %v1732_v50, %v790_v15 }
 0x154   : > { %v827_v19 = vmax.f32 %v791_v16, 0.0 }
 0x159   : > { %v792_v17 = vpop.f32.mrf.mxu0 }
 0x15a   : > { %v793_v18 = vadd.f32 %v1732_v50, %v792_v17 }
 0x15c   : > { %v828_v20 = vmax.f32 %v793_v18, 0.0 }
 0x15e   : > { %v842_v21 = vpack.c.bf16 %v828_v20, %v827_v19 }
 0x160   : > { %1392 = vmatmul.msk.bf16.gmra.mxu1 %vm730_vm0, %v842_v21 }
 0x161   : > { %v795_v22 = vpop.f32.mrf.mxu0 }
 0x162   : > { %v796_v23 = vadd.f32 %v1732_v50, %v795_v22 }
 0x164   : > { %v829_v28 = vmax.f32 %v796_v23, 0.0 }
 0x169   : > { %v797_v24 = vpop.f32.mrf.mxu0 }
 0x16a   : > { %v798_v27 = vadd.f32 %v1732_v50, %v797_v24 }
 0x16c   : > { %v830_v29 = vmax.f32 %v798_v27, 0.0 }
 0x16e   : > { %v843_v30 = vpack.c.bf16 %v830_v29, %v829_v28 }
 0x170   : > { %1393 = vmatmul.msk.bf16.gmra.mxu1 %vm730_vm0, %v843_v30 }
 0x171   : > { %v800_v31 = vpop.f32.mrf.mxu0 }
 0x172   : > { %v801_v33 = vadd.f32 %v1732_v50, %v800_v31 }
 0x174   : > { %v831_v37 = vmax.f32 %v801_v33, 0.0 }
 0x179   : > { %v802_v34 = vpop.f32.mrf.mxu0 }
 0x17a   : > { %v803_v35 = vadd.f32 %v1732_v50, %v802_v34 }
 0x17c   : > { %v832_v38 = vmax.f32 %v803_v35, 0.0 }
 0x17e   : > { %v844_v39 = vpack.c.bf16 %v832_v38, %v831_v37 }
 0x180   : > { %1394 = vmatmul.msk.bf16.gmra.mxu1 %vm730_vm0, %v844_v39 }
 0x181   : > { %v805_v41 = vpop.f32.mrf.mxu0 }
 0x182   : > { %v806_v44 = vadd.f32 %v1732_v50, %v805_v41 }
 0x184   : > { %v833_v47 = vmax.f32 %v806_v44, 0.0 }
 0x189   : > { %v807_v45 = vpop.f32.mrf.mxu0 }
 0x18a   : > { %v808_v46 = vadd.f32 %v1732_v50, %v807_v45 }
 0x18c   : > { %v834_v48 = vmax.f32 %v808_v46, 0.0 }
 0x18e   : > { %v845_v49 = vpack.c.bf16 %v834_v48, %v833_v47 }
 0x190   : > { %1395 = vmatmul.msk.bf16.gmra.mxu1 %vm730_vm0, %v845_v49 }
 0x191   : > { %v810_v51 = vpop.f32.mrf.mxu0 }
 0x192   : > { %v811_v52 = vadd.f32 %v1732_v50, %v810_v51 }
 0x194   : > { %v835_v55 = vmax.f32 %v811_v52, 0.0  ;;  %v1457_v52 = vld [vmem:[%s1933_s9 + $0x8] sm:$0xff] }
 0x195   : > { %1211 = vmatpush.bf16.msra.mxu3 %v1457_v52 }
 0x199   : > { %v812_v53 = vpop.f32.mrf.mxu0 }
 0x19a   : > { %v813_v54 = vadd.f32 %v1732_v50, %v812_v53 }
 0x19c   : > { %v836_v56 = vmax.f32 %v813_v54, 0.0 }
 0x19d   : > { %v923_v26 = vpop.f32.mrf.mxu1 }
 0x19e   : > { %v846_v57 = vpack.c.bf16 %v836_v56, %v835_v55  ;;  %v924_v59 = vadd.f32 %v1778_v25, %v923_v26  ;;  %v1456_v56 = vld [vmem:[%s1933_s9] sm:$0xff] }
 0x19f   : > { %1212 = vmatpush.bf16.msra.mxu3 %v1456_v56 }
 0x1a0   : > { %1396 = vmatmul.msk.bf16.gmra.mxu1 %vm730_vm0, %v846_v57  ;;  %v972_v63 = vmax.f32 %v924_v59, 0.0 }
 0x1a1   : > { %v815_v58 = vpop.f32.mrf.mxu0 }
 0x1a2   : > { %v816_v61 = vadd.f32 %v1732_v50, %v815_v58 }
 0x1a4   : > { %v837_v1 = vmax.f32 %v816_v61, 0.0 }
 0x1a5   : > { %v925_v60 = vpop.f32.mrf.mxu1 }
 0x1a6   : > { %v926_v62 = vadd.f32 %v1778_v25, %v925_v60  ;;  %v847_v4 = vpack.c.bf16 %v837_v1, %v837_v1 }
 0x1a8   : > { %v973_v0 = vmax.f32 %v926_v62, 0.0 }
 0x1a9   : > { %v817_v32 = vpop.f32.mrf.mxu0 }
 0x1aa   : > { %v991_v2 = vpack.c.bf16 %v973_v0, %v972_v63 }
 0x1ac   : > { %1414 = vmatmul.msk.bf16.vlgmr.msra.gmra.mxu2 %vm730_vm0, %v991_v2  ;;  %v1820_v2 = vld [vmem:[%s1932_s8] ss:$0 sm:$0xff] }
 0x1ad   : > { %v928_v3 = vpop.f32.mrf.mxu1 }
 0x1ae   : > { %v929_v5 = vadd.f32 %v1778_v25, %v928_v3 }
 0x1b0   : > { %1397 = vmatmul.msk.bf16.gmra.mxu1 %vm730_vm0, %v847_v4  ;;  %v974_v8 = vmax.f32 %v929_v5, 0.0 }
 0x1b5   : > { %v930_v6 = vpop.f32.mrf.mxu1 }
 0x1b6   : > { %v931_v7 = vadd.f32 %v1778_v25, %v930_v6 }
 0x1b8   : > { %v975_v50 = vmax.f32 %v931_v7, 0.0 }
 0x1ba   : > { %v992_v9 = vpack.c.bf16 %v975_v50, %v974_v8 }
 0x1bc   : > { %1415 = vmatmul.msk.bf16.gmra.mxu2 %vm730_vm0, %v992_v9 }
 0x1bd   : > { %v933_v10 = vpop.f32.mrf.mxu1 }
 0x1be   : > { %v934_v11 = vadd.f32 %v1778_v25, %v933_v10 }
 0x1c0   : > { %v976_v14 = vmax.f32 %v934_v11, 0.0 }
 0x1c5   : > { %v935_v12 = vpop.f32.mrf.mxu1 }
 0x1c6   : > { %v936_v13 = vadd.f32 %v1778_v25, %v935_v12 }
 0x1c8   : > { %v977_v15 = vmax.f32 %v936_v13, 0.0 }
 0x1ca   : > { %v993_v16 = vpack.c.bf16 %v977_v15, %v976_v14 }
 0x1cc   : > { %1416 = vmatmul.msk.bf16.gmra.mxu2 %vm730_vm0, %v993_v16 }
 0x1cd   : > { %v938_v17 = vpop.f32.mrf.mxu1 }
 0x1ce   : > { %v939_v18 = vadd.f32 %v1778_v25, %v938_v17 }
 0x1d0   : > { %v978_v21 = vmax.f32 %v939_v18, 0.0 }
 0x1d5   : > { %v940_v19 = vpop.f32.mrf.mxu1 }
 0x1d6   : > { %v941_v20 = vadd.f32 %v1778_v25, %v940_v19 }
 0x1d8   : > { %v979_v22 = vmax.f32 %v941_v20, 0.0 }
 0x1da   : > { %v994_v23 = vpack.c.bf16 %v979_v22, %v978_v21 }
 0x1dc   : > { %1417 = vmatmul.msk.bf16.gmra.mxu2 %vm730_vm0, %v994_v23 }
 0x1dd   : > { %v943_v24 = vpop.f32.mrf.mxu1 }
 0x1de   : > { %v944_v27 = vadd.f32 %v1778_v25, %v943_v24 }
 0x1e0   : > { %v980_v30 = vmax.f32 %v944_v27, 0.0 }
 0x1e5   : > { %v945_v28 = vpop.f32.mrf.mxu1 }
 0x1e6   : > { %v946_v29 = vadd.f32 %v1778_v25, %v945_v28 }
 0x1e8   : > { %v981_v31 = vmax.f32 %v946_v29, 0.0 }
 0x1ea   : > { %v995_v33 = vpack.c.bf16 %v981_v31, %v980_v30 }
 0x1ec   : > { %1418 = vmatmul.msk.bf16.gmra.mxu2 %vm730_vm0, %v995_v33 }
 0x1ed   : > { %v948_v34 = vpop.f32.mrf.mxu1 }
 0x1ee   : > { %v949_v35 = vadd.f32 %v1778_v25, %v948_v34 }
 0x1f0   : > { %v982_v38 = vmax.f32 %v949_v35, 0.0 }
 0x1f5   : > { %v950_v36 = vpop.f32.mrf.mxu1 }
 0x1f6   : > { %v951_v37 = vadd.f32 %v1778_v25, %v950_v36 }
 0x1f8   : > { %v983_v39 = vmax.f32 %v951_v37, 0.0 }
 0x1fa   : > { %v996_v40 = vpack.c.bf16 %v983_v39, %v982_v38 }
 0x1fc   : > { %1419 = vmatmul.msk.bf16.gmra.mxu2 %vm730_vm0, %v996_v40 }
 0x1fd   : > { %v953_v41 = vpop.f32.mrf.mxu1 }
 0x1fe   : > { %v954_v42 = vadd.f32 %v1778_v25, %v953_v41 }
 0x200   : > { %v984_v45 = vmax.f32 %v954_v42, 0.0 }
 0x205   : > { %v955_v43 = vpop.f32.mrf.mxu1 }
 0x206   : > { %v956_v44 = vadd.f32 %v1778_v25, %v955_v43 }
 0x208   : > { %v985_v46 = vmax.f32 %v956_v44, 0.0 }
 0x20a   : > { %v997_v47 = vpack.c.bf16 %v985_v46, %v984_v45 }
 0x20c   : > { %1420 = vmatmul.msk.bf16.gmra.mxu2 %vm730_vm0, %v997_v47 }
 0x20d   : > { %v958_v48 = vpop.f32.mrf.mxu1 }
 0x20e   : > { %v959_v49 = vadd.f32 %v1778_v25, %v958_v48 }
 0x210   : > { %v986_v54 = vmax.f32 %v959_v49, 0.0 }
 0x215   : > { %v960_v51 = vpop.f32.mrf.mxu1 }
 0x216   : > { %v961_v53 = vadd.f32 %v1778_v25, %v960_v51 }
 0x218   : > { %v987_v55 = vmax.f32 %v961_v53, 0.0 }
 0x21a   : > { %v998_v26 = vpack.c.bf16 %v987_v55, %v986_v54 }
 0x21c   : > { %1421 = vmatmul.msk.bf16.gmra.mxu2 %vm730_vm0, %v998_v26 }
 0x21d   : > { %v963_v57 = vpop.f32.mrf.mxu1 }
 0x21e   : > { %v964_v58 = vadd.f32 %v1778_v25, %v963_v57 }
 0x220   : > { %v988_v61 = vmax.f32 %v964_v58, 0.0 }
 0x225   : > { %v965_v59 = vpop.f32.mrf.mxu1 }
 0x226   : > { %v966_v60 = vadd.f32 %v1778_v25, %v965_v59 }
 0x228   : > { %v989_v62 = vmax.f32 %v966_v60, 0.0 }
 0x22a   : > { %v999_v63 = vpack.c.bf16 %v989_v62, %v988_v61 }
 0x22c   : > { %1422 = vmatmul.msk.bf16.gmra.mxu2 %vm730_vm0, %v999_v63 }
 0x22d   : > { %v968_v0 = vpop.f32.mrf.mxu1 }
 0x22e   : > { %v969_v1 = vadd.f32 %v1778_v25, %v968_v0 }
 0x22f   : > { %v1076_v32 = vpop.f32.mrf.mxu2 }
 0x230   : > { %v990_v4 = vmax.f32 %v969_v1, 0.0  ;;  %v1077_v5 = vadd.f32 %v1820_v2, %v1076_v32 }
 0x232   : > { %v1000_v8 = vpack.c.bf16 %v990_v4, %v990_v4  ;;  %v1125_v50 = vmax.f32 %v1077_v5, 0.0  ;;  %v1853_v5 = vld [vmem:[%s1934_s10] ss:$0 sm:$0xff] }
 0x235   : > { %v970_v3 = vpop.f32.mrf.mxu1 }
 0x237   : > { %v1078_v6 = vpop.f32.mrf.mxu2 }
 0x238   : > { %v1079_v7 = vadd.f32 %v1820_v2, %v1078_v6 }
 0x23a   : > { %v1126_v9 = vmax.f32 %v1079_v7, 0.0 }
 0x23c   : > { %v1144_v10 = vpack.c.bf16 %v1126_v9, %v1125_v50  ;;  %1423 = vmatmul.msk.bf16.gmra.mxu2 %vm730_vm0, %v1000_v8 }
 0x23e   : > { %1432 = vmatmul.msk.bf16.vlgmr.msra.gmra.mxu3 %vm1174_vm1, %v1144_v10 }
 0x23f   : > { %v1081_v25 = vpop.f32.mrf.mxu2 }
 0x240   : > { %v1082_v11 = vadd.f32 %v1820_v2, %v1081_v25 }
 0x242   : > { %v1127_v14 = vmax.f32 %v1082_v11, 0.0 }
 0x247   : > { %v1083_v12 = vpop.f32.mrf.mxu2 }
 0x248   : > { %v1084_v13 = vadd.f32 %v1820_v2, %v1083_v12 }
 0x24a   : > { %v1128_v15 = vmax.f32 %v1084_v13, 0.0 }
 0x24c   : > { %v1145_v16 = vpack.c.bf16 %v1128_v15, %v1127_v14 }
 0x24e   : > { %1433 = vmatmul.msk.bf16.gmra.mxu3 %vm1174_vm1, %v1145_v16 }
 0x24f   : > { %v1086_v17 = vpop.f32.mrf.mxu2 }
 0x250   : > { %v1087_v18 = vadd.f32 %v1820_v2, %v1086_v17 }
 0x252   : > { %v1129_v21 = vmax.f32 %v1087_v18, 0.0 }
 0x257   : > { %v1088_v19 = vpop.f32.mrf.mxu2 }
 0x258   : > { %v1089_v20 = vadd.f32 %v1820_v2, %v1088_v19 }
 0x25a   : > { %v1130_v22 = vmax.f32 %v1089_v20, 0.0 }
 0x25c   : > { %v1146_v23 = vpack.c.bf16 %v1130_v22, %v1129_v21 }
 0x25e   : > { %1434 = vmatmul.msk.bf16.gmra.mxu3 %vm1174_vm1, %v1146_v23 }
 0x25f   : > { %v1091_v24 = vpop.f32.mrf.mxu2 }
 0x260   : > { %v1092_v27 = vadd.f32 %v1820_v2, %v1091_v24 }
 0x262   : > { %v1131_v30 = vmax.f32 %v1092_v27, 0.0 }
 0x267   : > { %v1093_v28 = vpop.f32.mrf.mxu2 }
 0x268   : > { %v1094_v29 = vadd.f32 %v1820_v2, %v1093_v28 }
 0x26a   : > { %v1132_v31 = vmax.f32 %v1094_v29, 0.0 }
 0x26c   : > { %v1147_v33 = vpack.c.bf16 %v1132_v31, %v1131_v30 }
 0x26e   : > { %1435 = vmatmul.msk.bf16.gmra.mxu3 %vm1174_vm1, %v1147_v33 }
 0x26f   : > { %v1096_v34 = vpop.f32.mrf.mxu2 }
 0x270   : > { %v1097_v35 = vadd.f32 %v1820_v2, %v1096_v34 }
 0x272   : > { %v1133_v38 = vmax.f32 %v1097_v35, 0.0 }
 0x277   : > { %v1098_v36 = vpop.f32.mrf.mxu2 }
 0x278   : > { %v1099_v37 = vadd.f32 %v1820_v2, %v1098_v36 }
 0x27a   : > { %v1134_v39 = vmax.f32 %v1099_v37, 0.0 }
 0x27c   : > { %v1148_v40 = vpack.c.bf16 %v1134_v39, %v1133_v38 }
 0x27e   : > { %1436 = vmatmul.msk.bf16.gmra.mxu3 %vm1174_vm1, %v1148_v40 }
 0x27f   : > { %v1101_v41 = vpop.f32.mrf.mxu2 }
 0x280   : > { %v1102_v42 = vadd.f32 %v1820_v2, %v1101_v41 }
 0x282   : > { %v1135_v45 = vmax.f32 %v1102_v42, 0.0 }
 0x287   : > { %v1103_v43 = vpop.f32.mrf.mxu2 }
 0x288   : > { %v1104_v44 = vadd.f32 %v1820_v2, %v1103_v43 }
 0x28a   : > { %v1136_v46 = vmax.f32 %v1104_v44, 0.0 }
 0x28c   : > { %v1149_v47 = vpack.c.bf16 %v1136_v46, %v1135_v45 }
 0x28e   : > { %1437 = vmatmul.msk.bf16.gmra.mxu3 %vm1174_vm1, %v1149_v47 }
 0x28f   : > { %v1106_v48 = vpop.f32.mrf.mxu2 }
 0x290   : > { %v1107_v49 = vadd.f32 %v1820_v2, %v1106_v48 }
 0x292   : > { %v1137_v53 = vmax.f32 %v1107_v49, 0.0 }
 0x297   : > { %v1108_v51 = vpop.f32.mrf.mxu2 }
 0x298   : > { %v1109_v52 = vadd.f32 %v1820_v2, %v1108_v51 }
 0x29a   : > { %v1138_v54 = vmax.f32 %v1109_v52, 0.0 }
 0x29c   : > { %v1150_v55 = vpack.c.bf16 %v1138_v54, %v1137_v53 }
 0x29e   : > { %1438 = vmatmul.msk.bf16.gmra.mxu3 %vm1174_vm1, %v1150_v55 }
 0x29f   : > { %v1111_v56 = vpop.f32.mrf.mxu2 }
 0x2a0   : > { %v1112_v26 = vadd.f32 %v1820_v2, %v1111_v56 }
 0x2a2   : > { %v1139_v59 = vmax.f32 %v1112_v26, 0.0 }
 0x2a7   : > { %v1113_v57 = vpop.f32.mrf.mxu2 }
 0x2a8   : > { %v1114_v58 = vadd.f32 %v1820_v2, %v1113_v57 }
 0x2aa   : > { %v1140_v60 = vmax.f32 %v1114_v58, 0.0 }
 0x2ac   : > { %v1151_v61 = vpack.c.bf16 %v1140_v60, %v1139_v59 }
 0x2ae   : > { %1439 = vmatmul.msk.bf16.gmra.mxu3 %vm1174_vm1, %v1151_v61 }
 0x2af   : > { %v1116_v62 = vpop.f32.mrf.mxu2 }
 0x2b0   : > { %v1117_v63 = vadd.f32 %v1820_v2, %v1116_v62 }
 0x2b2   : > { %v1141_v1 = vmax.f32 %v1117_v63, 0.0 }
 0x2b7   : > { %v1118_v0 = vpop.f32.mrf.mxu2 }
 0x2b8   : > { %v1119_v32 = vadd.f32 %v1820_v2, %v1118_v0 }
 0x2ba   : > { %v1142_v3 = vmax.f32 %v1119_v32, 0.0 }
 0x2bc   : > { %v1152_v4 = vpack.c.bf16 %v1142_v3, %v1141_v1 }
 0x2be   : > { %1440 = vmatmul.msk.bf16.gmra.mxu3 %vm1174_vm1, %v1152_v4 }
 0x2bf   : > { %v1121_v6 = vpop.f32.mrf.mxu2 }
 0x2c0   : > { %v1122_v50 = vadd.f32 %v1820_v2, %v1121_v6 }
 0x2c1   : > { %v1214_v7 = vpop.f32.mrf.mxu3 }
 0x2c2   : > { %v1215_v8 = vadd.f32 %v1853_v5, %v1214_v7  ;;  %v1143_v10 = vmax.f32 %v1122_v50, 0.0 }
 0x2c4   : > { %1264 = vst.msk [vmem:[%s1860_s18] sm:$0xff] %vm1263_vm2, %v1215_v8  ;;  %v1153_v12 = vpack.c.bf16 %v1143_v10, %v1143_v10 }
 0x2c7   : > { %v1123_v9 = vpop.f32.mrf.mxu2 }
 0x2c9   : > { %v1216_v25 = vpop.f32.mrf.mxu3 }
 0x2ca   : > { %v1217_v11 = vadd.f32 %v1853_v5, %v1216_v25 }
 0x2cc   : > { %1265 = vst.msk [vmem:[%s1860_s18 + $0x8] sm:$0xff] %vm1263_vm2, %v1217_v11 }
 0x2ce   : > { %1441 = vmatmul.msk.bf16.gmra.mxu3 %vm1174_vm1, %v1153_v12 }
 0x2d1   : > { %v1219_v13 = vpop.f32.mrf.mxu3 }
 0x2d2   : > { %v1220_v14 = vadd.f32 %v1853_v5, %v1219_v13 }
 0x2d4   : > { %1266 = vst.msk [vmem:[%s1860_s18 + $0x10] sm:$0xff] %vm1263_vm2, %v1220_v14 }
 0x2d9   : > { %v1221_v2 = vpop.f32.mrf.mxu3 }
 0x2da   : > { %v1222_v15 = vadd.f32 %v1853_v5, %v1221_v2 }
 0x2dc   : > { %1267 = vst.msk [vmem:[%s1860_s18 + $0x18] sm:$0xff] %vm1263_vm2, %v1222_v15 }
 0x2e1   : > { %v1224_v16 = vpop.f32.mrf.mxu3 }
 0x2e2   : > { %v1225_v17 = vadd.f32 %v1853_v5, %v1224_v16 }
 0x2e4   : > { %1268 = vst.msk [vmem:[%s1860_s18 + $0x20] sm:$0xff] %vm1263_vm2, %v1225_v17 }
 0x2e9   : > { %v1226_v18 = vpop.f32.mrf.mxu3 }
 0x2ea   : > { %v1227_v19 = vadd.f32 %v1853_v5, %v1226_v18 }
 0x2ec   : > { %1269 = vst.msk [vmem:[%s1860_s18 + $0x28] sm:$0xff] %vm1263_vm2, %v1227_v19 }
 0x2f1   : > { %v1229_v20 = vpop.f32.mrf.mxu3 }
 0x2f2   : > { %v1230_v21 = vadd.f32 %v1853_v5, %v1229_v20 }
 0x2f4   : > { %1270 = vst.msk [vmem:[%s1860_s18 + $0x30] sm:$0xff] %vm1263_vm2, %v1230_v21 }
 0x2f9   : > { %v1231_v22 = vpop.f32.mrf.mxu3 }
 0x2fa   : > { %v1232_v23 = vadd.f32 %v1853_v5, %v1231_v22 }
 0x2fc   : > { %1271 = vst.msk [vmem:[%s1860_s18 + $0x38] sm:$0xff] %vm1263_vm2, %v1232_v23 }
 0x301   : > { %v1234_v24 = vpop.f32.mrf.mxu3 }
 0x302   : > { %v1235_v27 = vadd.f32 %v1853_v5, %v1234_v24 }
 0x304   : > { %1272 = vst.msk [vmem:[%s1860_s18 + $0x40] sm:$0xff] %vm1263_vm2, %v1235_v27 }
 0x309   : > { %v1236_v28 = vpop.f32.mrf.mxu3 }
 0x30a   : > { %v1237_v29 = vadd.f32 %v1853_v5, %v1236_v28 }
 0x30c   : > { %1273 = vst.msk [vmem:[%s1860_s18 + $0x48] sm:$0xff] %vm1263_vm2, %v1237_v29 }
 0x311   : > { %v1239_v30 = vpop.f32.mrf.mxu3 }
 0x312   : > { %v1240_v31 = vadd.f32 %v1853_v5, %v1239_v30 }
 0x314   : > { %1274 = vst.msk [vmem:[%s1860_s18 + $0x50] sm:$0xff] %vm1263_vm2, %v1240_v31 }
 0x319   : > { %v1241_v33 = vpop.f32.mrf.mxu3 }
 0x31a   : > { %v1242_v34 = vadd.f32 %v1853_v5, %v1241_v33 }
 0x31c   : > { %1275 = vst.msk [vmem:[%s1860_s18 + $0x58] sm:$0xff] %vm1263_vm2, %v1242_v34 }
 0x321   : > { %v1244_v35 = vpop.f32.mrf.mxu3 }
 0x322   : > { %v1245_v36 = vadd.f32 %v1853_v5, %v1244_v35 }
 0x324   : > { %1276 = vst.msk [vmem:[%s1860_s18 + $0x60] sm:$0xff] %vm1263_vm2, %v1245_v36 }
 0x329   : > { %v1246_v37 = vpop.f32.mrf.mxu3 }
 0x32a   : > { %v1247_v38 = vadd.f32 %v1853_v5, %v1246_v37 }
 0x32c   : > { %1277 = vst.msk [vmem:[%s1860_s18 + $0x68] sm:$0xff] %vm1263_vm2, %v1247_v38 }
 0x331   : > { %v1249_v39 = vpop.f32.mrf.mxu3 }
 0x332   : > { %v1250_v40 = vadd.f32 %v1853_v5, %v1249_v39 }
 0x334   : > { %1278 = vst.msk [vmem:[%s1860_s18 + $0x70] sm:$0xff] %vm1263_vm2, %v1250_v40 }
 0x339   : > { %v1251_v41 = vpop.f32.mrf.mxu3 }
 0x33a   : > { %v1252_v42 = vadd.f32 %v1853_v5, %v1251_v41 }
 0x33c   : > { %1279 = vst.msk [vmem:[%s1860_s18 + $0x78] sm:$0xff] %vm1263_vm2, %v1252_v42 }
 0x341   : > { %v1254_v43 = vpop.f32.mrf.mxu3 }
 0x342   : > { %v1255_v44 = vadd.f32 %v1853_v5, %v1254_v43 }
 0x344   : > { %1280 = vst.msk [vmem:[%s1860_s18 + $0x80] sm:$0xff] %vm1263_vm2, %v1255_v44 }
 0x349   : > { %v1256_v45 = vpop.f32.mrf.mxu3 }
 0x34a   : > { %v1257_v46 = vadd.f32 %v1853_v5, %v1256_v45 }
 0x34c   : > { %1281 = vst.msk [vmem:[%s1860_s18 + $0x88] sm:$0xff] %vm1263_vm2, %v1257_v46 }
 0x351   : > { %v1259_v47 = vpop.f32.mrf.mxu3 }
 0x352   : > { %v1260_v48 = vadd.f32 %v1853_v5, %v1259_v47 }
 0x354   : > { %1282 = vst.msk [vmem:[%s1860_s18 + $0x90] sm:$0xff] %vm1263_vm2, %v1260_v48 }
 0x359   : > { %v1261_v49 = vpop.f32.mrf.mxu3 }
 0x35a PF: > { %s21_s17 = sadd.s32 1, %s1503_s17  }
 0x35b   : > { %p18_p4 = scmp.ge.s32.totalorder %s21_s17, 4  }
 0x35d   :  { %20 = sbr.rel (!%p18_p4) target bundleno = 1 (0x1), region = 94 }

</bundles_post_ra>
